<compile_context>
chip_gen: v7x
topology: tpu7x:2x2x1
jax: 0.10.0
libtpu: 0.0.40
codegen_flags: <defaults>
</compile_context>

<pallas_src>
import jax
import jax.numpy as jnp
from jax import lax
from jax.experimental import pallas as pl
from jax.experimental.pallas import tpu as pltpu


# ---------------- config ----------------
class Cfg:
    FRCN_FEAT_SIZE = 16
    LSTM_OUT_SIZE = 32
    HIDDEN_SIZE = 32
    MFB_K = 2
    MFB_O = 16
    I_GLIMPSES = 2
    Q_GLIMPSES = 2
    DROPOUT_R = 0.1      # eval mode -> identity
    HIGH_ORDER = True    # MFH path (two chained MFB blocks)


# ---------------- fused Pallas kernel ----------------
def _build_kernel(*, n_batch, T, C, L, I, K, O, QG, IG, high_order):
    """Returns a kernel closure over the static problem sizes."""
    KO = K * O
    f32 = jnp.float32

    def kernel(*refs):
        if high_order:
            (ques_ref, img_ref,
             qatt_w1, qatt_b1, qatt_w2, qatt_b2,
             imfb_wi, imfb_bi, imfb_wq, imfb_bq,
             iatt_w1, iatt_b1, iatt_w2, iatt_b2,
             mfh1_wi, mfh1_bi, mfh1_wq, mfh1_bq,
             mfh2_wi, mfh2_bi, mfh2_wq, mfh2_bq,
             out_ref) = refs
        else:
            (ques_ref, img_ref,
             qatt_w1, qatt_b1, qatt_w2, qatt_b2,
             imfb_wi, imfb_bi, imfb_wq, imfb_bq,
             iatt_w1, iatt_b1, iatt_w2, iatt_b2,
             mfh1_wi, mfh1_bi, mfh1_wq, mfh1_bq,
             out_ref) = refs
            mfh2_wi = mfh2_bi = mfh2_wq = mfh2_bq = None

        def dot(a, b):
            return jnp.dot(a, b, preferred_element_type=f32)

        # ---- sum-pool matrix over K consecutive features (AvgPool1d(K)*K) ----
        # pool[j, o] = 1  iff  j in [o*K, o*K + K)
        row = lax.broadcasted_iota(jnp.int32, (KO, O), 0)
        col = lax.broadcasted_iota(jnp.int32, (KO, O), 1)
        mask = row == col * K
        for k in range(1, K):
            mask = jnp.logical_or(mask, row == col * K + k)
        pool = jnp.where(mask, 1.0, 0.0).astype(f32)

        def att_pool(x_mlp, x_feat, w1, b1, w2, b2, n_glimpses):
            """MLP -> softmax over rows (seq/channel axis) -> per-glimpse weighted
            sums of x_feat.  Returns list of (1, Df) rows (one per glimpse)."""
            h = jnp.maximum(dot(x_mlp, w1[...]) + b1[...], 0.0)   # dropout = identity
            m = dot(h, w2[...]) + b2[...]                         # (S, G)
            m = m - jnp.max(m, axis=0, keepdims=True)
            e = jnp.exp(m)
            p = e / jnp.sum(e, axis=0, keepdims=True)             # softmax over dim=1 (rows)
            return [jnp.sum(p[:, g:g + 1] * x_feat, axis=0, keepdims=True)
                    for g in range(n_glimpses)]

        def proj_concat(rows, w_ref, b_ref, d):
            """Equivalent to concat(rows, axis=1) @ W + b, without forming the
            concatenated vector (W is sliced into per-glimpse blocks)."""
            acc = b_ref[...]
            for g, r in enumerate(rows):
                acc = acc + dot(r, w_ref[g * d:(g + 1) * d, :])
            return acc                                            # (1, KO)

        def mfb(pi, pq, exp_in=None):
            """Elementwise fuse, K-sum pool, signed sqrt, per-sample L2 normalize."""
            eo = pi * pq                                          # (Cb, KO)
            if exp_in is not None:                                # only MFH2 path
                eo = eo * exp_in
            z = dot(eo, pool)                                     # (Cb, O)
            z = jnp.sqrt(jnp.maximum(z, 0.0)) - jnp.sqrt(jnp.maximum(-z, 0.0))
            nrm = jnp.sqrt(jnp.sum(z * z))                        # L2 over flattened (Cb*O)
            z = z / jnp.maximum(nrm, 1e-12)
            return z, eo

        # ---- whole batch, statically unrolled (N is tiny) ----
        for n in range(n_batch):
            qf = ques_ref[n]                                      # (T, L)
            imf = img_ref[n]                                      # (C, I)

            # QAtt: attention over question tokens (ques_feat used once for both roles)
            qa_rows = att_pool(qf, qf, qatt_w1, qatt_b1, qatt_w2, qatt_b2, QG)

            # IAtt MFB (is_first=True -> no exp_in)
            pi = dot(imf, imfb_wi[...]) + imfb_bi[...]            # (C, KO)
            pq = proj_concat(qa_rows, imfb_wq, imfb_bq, L)        # (1, KO)
            z_i, _ = mfb(pi, pq)                                  # (C, O)

            # IAtt: attention over image regions
            fuse_rows = att_pool(z_i, imf, iatt_w1, iatt_b1, iatt_w2, iatt_b2, IG)

            # MFH1
            pi1 = proj_concat(fuse_rows, mfh1_wi, mfh1_bi, I)
            pq1 = proj_concat(qa_rows, mfh1_wq, mfh1_bq, L)
            z1, exp1 = mfb(pi1, pq1)                              # (1, O), (1, KO)

            if high_order:
                # MFH2 (is_first=False -> multiply by exp1 held in vregs)
                pi2 = proj_concat(fuse_rows, mfh2_wi, mfh2_bi, I)
                pq2 = proj_concat(qa_rows, mfh2_wq, mfh2_bq, L)
                z2, _ = mfb(pi2, pq2, exp_in=exp1)                # (1, O)
                out_ref[n:n + 1, 0:O] = z1                        # single lane-dense slab
                out_ref[n:n + 1, O:2 * O] = z2
            else:
                out_ref[n:n + 1, 0:O] = z1

    return kernel


# ---------------- wrapper ----------------
def coatt_forward(p, cfg, img_feat, ques_feat):
    N, C, I = img_feat.shape
    _, T, L = ques_feat.shape
    K, O = cfg.MFB_K, cfg.MFB_O
    out_w = (2 * O) if cfg.HIGH_ORDER else O

    kernel = _build_kernel(n_batch=N, T=T, C=C, L=L, I=I, K=K, O=O,
                           QG=cfg.Q_GLIMPSES, IG=cfg.I_GLIMPSES,
                           high_order=cfg.HIGH_ORDER)

    inputs = [ques_feat, img_feat,
              p['qatt_w1'], p['qatt_b1'], p['qatt_w2'], p['qatt_b2'],
              p['iatt_mfb_wi'], p['iatt_mfb_bi'], p['iatt_mfb_wq'], p['iatt_mfb_bq'],
              p['iatt_w1'], p['iatt_b1'], p['iatt_w2'], p['iatt_b2'],
              p['mfh1_wi'], p['mfh1_bi'], p['mfh1_wq'], p['mfh1_bq']]
    if cfg.HIGH_ORDER:
        inputs += [p['mfh2_wi'], p['mfh2_bi'], p['mfh2_wq'], p['mfh2_bq']]

    def full_spec(a):
        nd = a.ndim
        return pl.BlockSpec(a.shape, lambda i, _nd=nd: (0,) * _nd)

    z = pl.pallas_call(
        kernel,
        out_shape=jax.ShapeDtypeStruct((N, out_w), jnp.float32),
        grid=(1,),                                   # single fused step, whole batch
        in_specs=[full_spec(a) for a in inputs],
        out_specs=pl.BlockSpec((N, out_w), lambda i: (0, 0)),
        compiler_params=pltpu.CompilerParams(dimension_semantics=("arbitrary",)),
    )(*inputs)
    return z


# ---------------- pure-JAX reference (for correctness check) ----------------
def _mlp_ref(x, w1, b1, w2, b2):
    return jnp.maximum(x @ w1 + b1, 0.0) @ w2 + b2


def _att_ref(x_mlp, x_feat, w1, b1, w2, b2):
    maps = jax.nn.softmax(_mlp_ref(x_mlp, w1, b1, w2, b2), axis=1)
    return jnp.einsum('nsg,nsd->ngd', maps, x_feat).reshape(x_mlp.shape[0], -1)


def _mfb_ref(img, ques, exp_in, wi, bi, wq, bq, K, O):
    exp_out = (img @ wi + bi) * (ques @ wq + bq) * exp_in
    N, C, _ = exp_out.shape
    z = exp_out.reshape(N, C, O, K).sum(-1)
    z = jnp.sqrt(jnp.maximum(z, 0.0)) - jnp.sqrt(jnp.maximum(-z, 0.0))
    flat = z.reshape(N, -1)
    flat = flat / jnp.maximum(jnp.linalg.norm(flat, axis=1, keepdims=True), 1e-12)
    return flat.reshape(N, C, O), exp_out


def coatt_ref(p, cfg, img_feat, ques_feat):
    N, C, _ = img_feat.shape
    K, O = cfg.MFB_K, cfg.MFB_O
    KO = K * O
    qa = _att_ref(ques_feat, ques_feat, p['qatt_w1'], p['qatt_b1'], p['qatt_w2'], p['qatt_b2'])
    z_i, _ = _mfb_ref(img_feat, qa[:, None, :], jnp.ones((N, C, KO)),
                      p['iatt_mfb_wi'], p['iatt_mfb_bi'], p['iatt_mfb_wq'], p['iatt_mfb_bq'], K, O)
    fuse = _att_ref(z_i, img_feat, p['iatt_w1'], p['iatt_b1'], p['iatt_w2'], p['iatt_b2'])
    z1, exp1 = _mfb_ref(fuse[:, None, :], qa[:, None, :], jnp.ones((N, 1, KO)),
                        p['mfh1_wi'], p['mfh1_bi'], p['mfh1_wq'], p['mfh1_bq'], K, O)
    if cfg.HIGH_ORDER:
        z2, _ = _mfb_ref(fuse[:, None, :], qa[:, None, :], exp1,
                         p['mfh2_wi'], p['mfh2_bi'], p['mfh2_wq'], p['mfh2_bq'], K, O)
        return jnp.concatenate([z1[:, 0, :], z2[:, 0, :]], axis=1)
    return z1[:, 0, :]


# ---------------- deterministic parameter init ----------------
def init_params(key, cfg):
    def lin(k, din, dout):
        k1, k2 = jax.random.split(k)
        return (jax.random.normal(k1, (din, dout), jnp.float32) * 0.1,
                jax.random.normal(k2, (1, dout), jnp.float32) * 0.1)

    keys = jax.random.split(key, 10)
    KO = cfg.MFB_K * cfg.MFB_O
    QA = cfg.LSTM_OUT_SIZE * cfg.Q_GLIMPSES
    IA = cfg.FRCN_FEAT_SIZE * cfg.I_GLIMPSES
    p = {}
    p['qatt_w1'], p['qatt_b1'] = lin(keys[0], cfg.LSTM_OUT_SIZE, cfg.HIDDEN_SIZE)
    p['qatt_w2'], p['qatt_b2'] = lin(keys[1], cfg.HIDDEN_SIZE, cfg.Q_GLIMPSES)
    p['iatt_mfb_wi'], p['iatt_mfb_bi'] = lin(keys[2], cfg.FRCN_FEAT_SIZE, KO)
    p['iatt_mfb_wq'], p['iatt_mfb_bq'] = lin(keys[3], QA, KO)
    p['iatt_w1'], p['iatt_b1'] = lin(keys[4], cfg.MFB_O, cfg.HIDDEN_SIZE)
    p['iatt_w2'], p['iatt_b2'] = lin(keys[5], cfg.HIDDEN_SIZE, cfg.I_GLIMPSES)
    p['mfh1_wi'], p['mfh1_bi'] = lin(keys[6], IA, KO)
    p['mfh1_wq'], p['mfh1_bq'] = lin(keys[7], QA, KO)
    p['mfh2_wi'], p['mfh2_bi'] = lin(keys[8], IA, KO)
    p['mfh2_wq'], p['mfh2_bq'] = lin(keys[9], QA, KO)
    return p


if __name__ == "__main__":
    cfg = Cfg()
    key = jax.random.PRNGKey(0)
    kp, ki, kq = jax.random.split(key, 3)
    params = init_params(kp, cfg)

    N, C, T = 2, 4, 8
    img_feat = jax.random.normal(ki, (N, C, cfg.FRCN_FEAT_SIZE), jnp.float32)
    ques_feat = jax.random.normal(kq, (N, T, cfg.LSTM_OUT_SIZE), jnp.float32)

    fwd = jax.jit(lambda i, q: coatt_forward(params, cfg, i, q))
    z = jax.block_until_ready(fwd(img_feat, ques_feat))

    z_expected = coatt_ref(params, cfg, img_feat, ques_feat)
    assert z.shape == (N, (2 if cfg.HIGH_ORDER else 1) * cfg.MFB_O), z.shape
    assert jnp.allclose(z, z_expected, atol=2e-4, rtol=2e-3), \
        float(jnp.max(jnp.abs(z - z_expected)))
    print("KERNEL_OK")
</pallas_src>

<mosaic_0001>
module attributes {stable_mosaic.version = 11 : i64} {
  func.func @kernel(%arg0: i32, %arg1: memref<2x8x32xf32, #tpu.memory_space<vmem>>, %arg2: memref<2x4x16xf32, #tpu.memory_space<vmem>>, %arg3: memref<32x32xf32, #tpu.memory_space<vmem>>, %arg4: memref<1x32xf32, #tpu.memory_space<vmem>>, %arg5: memref<32x2xf32, #tpu.memory_space<vmem>>, %arg6: memref<1x2xf32, #tpu.memory_space<vmem>>, %arg7: memref<16x32xf32, #tpu.memory_space<vmem>>, %arg8: memref<1x32xf32, #tpu.memory_space<vmem>>, %arg9: memref<64x32xf32, #tpu.memory_space<vmem>>, %arg10: memref<1x32xf32, #tpu.memory_space<vmem>>, %arg11: memref<16x32xf32, #tpu.memory_space<vmem>>, %arg12: memref<1x32xf32, #tpu.memory_space<vmem>>, %arg13: memref<32x2xf32, #tpu.memory_space<vmem>>, %arg14: memref<1x2xf32, #tpu.memory_space<vmem>>, %arg15: memref<32x32xf32, #tpu.memory_space<vmem>>, %arg16: memref<1x32xf32, #tpu.memory_space<vmem>>, %arg17: memref<64x32xf32, #tpu.memory_space<vmem>>, %arg18: memref<1x32xf32, #tpu.memory_space<vmem>>, %arg19: memref<32x32xf32, #tpu.memory_space<vmem>>, %arg20: memref<1x32xf32, #tpu.memory_space<vmem>>, %arg21: memref<64x32xf32, #tpu.memory_space<vmem>>, %arg22: memref<1x32xf32, #tpu.memory_space<vmem>>, %arg23: memref<2x32xf32, #tpu.memory_space<vmem>>) attributes {dimension_semantics = [#tpu.dimension_semantics<arbitrary>], iteration_bounds = array<i64: 1>, scalar_prefetch = 0 : i64, scratch_operands = 0 : i64, tpu.core_type = #tpu.core_type<tc>, window_params = [{pipeline_mode = #tpu.pipeline_mode<synchronous>, transform_indices = @transform_0, window_bounds = array<i64: 2, 8, 32>}, {pipeline_mode = #tpu.pipeline_mode<synchronous>, transform_indices = @transform_1, window_bounds = array<i64: 2, 4, 16>}, {pipeline_mode = #tpu.pipeline_mode<synchronous>, transform_indices = @transform_2, window_bounds = array<i64: 32, 32>}, {pipeline_mode = #tpu.pipeline_mode<synchronous>, transform_indices = @transform_3, window_bounds = array<i64: 1, 32>}, {pipeline_mode = #tpu.pipeline_mode<synchronous>, transform_indices = @transform_4, window_bounds = array<i64: 32, 2>}, {pipeline_mode = #tpu.pipeline_mode<synchronous>, transform_indices = @transform_5, window_bounds = array<i64: 1, 2>}, {pipeline_mode = #tpu.pipeline_mode<synchronous>, transform_indices = @transform_6, window_bounds = array<i64: 16, 32>}, {pipeline_mode = #tpu.pipeline_mode<synchronous>, transform_indices = @transform_7, window_bounds = array<i64: 1, 32>}, {pipeline_mode = #tpu.pipeline_mode<synchronous>, transform_indices = @transform_8, window_bounds = array<i64: 64, 32>}, {pipeline_mode = #tpu.pipeline_mode<synchronous>, transform_indices = @transform_9, window_bounds = array<i64: 1, 32>}, {pipeline_mode = #tpu.pipeline_mode<synchronous>, transform_indices = @transform_10, window_bounds = array<i64: 16, 32>}, {pipeline_mode = #tpu.pipeline_mode<synchronous>, transform_indices = @transform_11, window_bounds = array<i64: 1, 32>}, {pipeline_mode = #tpu.pipeline_mode<synchronous>, transform_indices = @transform_12, window_bounds = array<i64: 32, 2>}, {pipeline_mode = #tpu.pipeline_mode<synchronous>, transform_indices = @transform_13, window_bounds = array<i64: 1, 2>}, {pipeline_mode = #tpu.pipeline_mode<synchronous>, transform_indices = @transform_14, window_bounds = array<i64: 32, 32>}, {pipeline_mode = #tpu.pipeline_mode<synchronous>, transform_indices = @transform_15, window_bounds = array<i64: 1, 32>}, {pipeline_mode = #tpu.pipeline_mode<synchronous>, transform_indices = @transform_16, window_bounds = array<i64: 64, 32>}, {pipeline_mode = #tpu.pipeline_mode<synchronous>, transform_indices = @transform_17, window_bounds = array<i64: 1, 32>}, {pipeline_mode = #tpu.pipeline_mode<synchronous>, transform_indices = @transform_18, window_bounds = array<i64: 32, 32>}, {pipeline_mode = #tpu.pipeline_mode<synchronous>, transform_indices = @transform_19, window_bounds = array<i64: 1, 32>}, {pipeline_mode = #tpu.pipeline_mode<synchronous>, transform_indices = @transform_20, window_bounds = array<i64: 64, 32>}, {pipeline_mode = #tpu.pipeline_mode<synchronous>, transform_indices = @transform_21, window_bounds = array<i64: 1, 32>}, {pipeline_mode = #tpu.pipeline_mode<synchronous>, transform_indices = @transform_22, window_bounds = array<i64: 2, 32>}]} {
    %0 = tpu.iota {dimensions = array<i32: 0>} : vector<32x16xi32>
    %1 = tpu.iota {dimensions = array<i32: 1>} : vector<32x16xi32>
    %c2_i32 = arith.constant 2 : i32
    %2 = vector.broadcast %c2_i32 : i32 to vector<32x16xi32>
    %3 = arith.muli %1, %2 : vector<32x16xi32>
    %4 = arith.cmpi eq, %0, %3 : vector<32x16xi32>
    %c2_i32_0 = arith.constant 2 : i32
    %5 = vector.broadcast %c2_i32_0 : i32 to vector<32x16xi32>
    %6 = arith.muli %1, %5 : vector<32x16xi32>
    %c1_i32 = arith.constant 1 : i32
    %7 = vector.broadcast %c1_i32 : i32 to vector<32x16xi32>
    %8 = arith.addi %6, %7 : vector<32x16xi32>
    %9 = arith.cmpi eq, %0, %8 : vector<32x16xi32>
    %10 = arith.ori %4, %9 : vector<32x16xi1>
    %cst = arith.constant 1.000000e+00 : f32
    %cst_1 = arith.constant 0.000000e+00 : f32
    %11 = vector.broadcast %cst : f32 to vector<32x16xf32>
    %12 = vector.broadcast %cst_1 : f32 to vector<32x16xf32>
    %13 = arith.select %10, %11, %12 : vector<32x16xi1>, vector<32x16xf32>
    %c0 = arith.constant 0 : index
    %c0_2 = arith.constant 0 : index
    %c0_3 = arith.constant 0 : index
    %14 = vector.load %arg1[%c0, %c0_2, %c0_3] : memref<2x8x32xf32, #tpu.memory_space<vmem>>, vector<1x8x32xf32>
    %15 = vector.shape_cast %14 : vector<1x8x32xf32> to vector<8x32xf32>
    %c0_4 = arith.constant 0 : index
    %c0_5 = arith.constant 0 : index
    %c0_6 = arith.constant 0 : index
    %16 = vector.load %arg2[%c0_4, %c0_5, %c0_6] : memref<2x4x16xf32, #tpu.memory_space<vmem>>, vector<1x4x16xf32>
    %17 = vector.shape_cast %16 : vector<1x4x16xf32> to vector<4x16xf32>
    %c0_7 = arith.constant 0 : index
    %c0_8 = arith.constant 0 : index
    %18 = vector.load %arg3[%c0_7, %c0_8] : memref<32x32xf32, #tpu.memory_space<vmem>>, vector<32x32xf32>
    %cst_9 = arith.constant dense<0.000000e+00> : vector<8x32xf32>
    %19 = tpu.matmul %15, %18, %cst_9 {dimension_numbers = #tpu.dot_dimension_numbers<[1], [0], [0], [1], [0, 0, 1, 1], [], []>} : vector<8x32xf32>, vector<32x32xf32>, vector<8x32xf32> -> vector<8x32xf32>
    %c0_10 = arith.constant 0 : index
    %c0_11 = arith.constant 0 : index
    %20 = vector.load %arg4[%c0_10, %c0_11] : memref<1x32xf32, #tpu.memory_space<vmem>>, vector<1x32xf32>
    %21 = vector.broadcast %20 : vector<1x32xf32> to vector<8x32xf32>
    %22 = arith.addf %19, %21 : vector<8x32xf32>
    %cst_12 = arith.constant 0.000000e+00 : f32
    %23 = vector.broadcast %cst_12 : f32 to vector<8x32xf32>
    %24 = arith.maximumf %22, %23 : vector<8x32xf32>
    %c0_13 = arith.constant 0 : index
    %c0_14 = arith.constant 0 : index
    %25 = vector.load %arg5[%c0_13, %c0_14] : memref<32x2xf32, #tpu.memory_space<vmem>>, vector<32x2xf32>
    %cst_15 = arith.constant dense<0.000000e+00> : vector<8x2xf32>
    %26 = tpu.matmul %24, %25, %cst_15 {dimension_numbers = #tpu.dot_dimension_numbers<[1], [0], [0], [1], [0, 0, 1, 1], [], []>} : vector<8x32xf32>, vector<32x2xf32>, vector<8x2xf32> -> vector<8x2xf32>
    %c0_16 = arith.constant 0 : index
    %c0_17 = arith.constant 0 : index
    %27 = vector.load %arg6[%c0_16, %c0_17] : memref<1x2xf32, #tpu.memory_space<vmem>>, vector<1x2xf32>
    %28 = vector.broadcast %27 : vector<1x2xf32> to vector<8x2xf32>
    %29 = arith.addf %26, %28 : vector<8x2xf32>
    %cst_18 = arith.constant dense<0xFF800000> : vector<2xf32>
    %30 = vector.multi_reduction <maximumf>, %29, %cst_18 [0] : vector<8x2xf32> to vector<2xf32>
    %31 = vector.shape_cast %30 : vector<2xf32> to vector<1x2xf32>
    %32 = vector.broadcast %31 : vector<1x2xf32> to vector<8x2xf32>
    %33 = arith.subf %29, %32 : vector<8x2xf32>
    %34 = math.exp %33 : vector<8x2xf32>
    %cst_19 = arith.constant dense<0.000000e+00> : vector<2xf32>
    %35 = vector.multi_reduction <add>, %34, %cst_19 [0] : vector<8x2xf32> to vector<2xf32>
    %36 = vector.shape_cast %35 : vector<2xf32> to vector<1x2xf32>
    %37 = vector.broadcast %36 : vector<1x2xf32> to vector<8x2xf32>
    %38 = arith.divf %34, %37 : vector<8x2xf32>
    %39 = vector.extract_strided_slice %38 {offsets = [0, 0], sizes = [8, 1], strides = [1, 1]} : vector<8x2xf32> to vector<8x1xf32>
    %40 = vector.broadcast %39 : vector<8x1xf32> to vector<8x32xf32>
    %41 = arith.mulf %40, %15 : vector<8x32xf32>
    %cst_20 = arith.constant dense<0.000000e+00> : vector<32xf32>
    %42 = vector.multi_reduction <add>, %41, %cst_20 [0] : vector<8x32xf32> to vector<32xf32>
    %43 = vector.shape_cast %42 : vector<32xf32> to vector<1x32xf32>
    %44 = vector.extract_strided_slice %38 {offsets = [0, 1], sizes = [8, 1], strides = [1, 1]} : vector<8x2xf32> to vector<8x1xf32>
    %45 = vector.broadcast %44 : vector<8x1xf32> to vector<8x32xf32>
    %46 = arith.mulf %45, %15 : vector<8x32xf32>
    %cst_21 = arith.constant dense<0.000000e+00> : vector<32xf32>
    %47 = vector.multi_reduction <add>, %46, %cst_21 [0] : vector<8x32xf32> to vector<32xf32>
    %48 = vector.shape_cast %47 : vector<32xf32> to vector<1x32xf32>
    %c0_22 = arith.constant 0 : index
    %c0_23 = arith.constant 0 : index
    %49 = vector.load %arg7[%c0_22, %c0_23] : memref<16x32xf32, #tpu.memory_space<vmem>>, vector<16x32xf32>
    %cst_24 = arith.constant dense<0.000000e+00> : vector<4x32xf32>
    %50 = tpu.matmul %17, %49, %cst_24 {dimension_numbers = #tpu.dot_dimension_numbers<[1], [0], [0], [1], [0, 0, 1, 1], [], []>} : vector<4x16xf32>, vector<16x32xf32>, vector<4x32xf32> -> vector<4x32xf32>
    %c0_25 = arith.constant 0 : index
    %c0_26 = arith.constant 0 : index
    %51 = vector.load %arg8[%c0_25, %c0_26] : memref<1x32xf32, #tpu.memory_space<vmem>>, vector<1x32xf32>
    %52 = vector.broadcast %51 : vector<1x32xf32> to vector<4x32xf32>
    %53 = arith.addf %50, %52 : vector<4x32xf32>
    %c0_27 = arith.constant 0 : index
    %c0_28 = arith.constant 0 : index
    %54 = vector.load %arg10[%c0_27, %c0_28] : memref<1x32xf32, #tpu.memory_space<vmem>>, vector<1x32xf32>
    %c0_29 = arith.constant 0 : index
    %c0_30 = arith.constant 0 : index
    %55 = vector.load %arg9[%c0_29, %c0_30] : memref<64x32xf32, #tpu.memory_space<vmem>>, vector<32x32xf32>
    %cst_31 = arith.constant dense<0.000000e+00> : vector<1x32xf32>
    %56 = tpu.matmul %43, %55, %cst_31 {dimension_numbers = #tpu.dot_dimension_numbers<[1], [0], [0], [1], [0, 0, 1, 1], [], []>} : vector<1x32xf32>, vector<32x32xf32>, vector<1x32xf32> -> vector<1x32xf32>
    %57 = arith.addf %54, %56 : vector<1x32xf32>
    %c32 = arith.constant 32 : index
    %c0_32 = arith.constant 0 : index
    %58 = vector.load %arg9[%c32, %c0_32] : memref<64x32xf32, #tpu.memory_space<vmem>>, vector<32x32xf32>
    %cst_33 = arith.constant dense<0.000000e+00> : vector<1x32xf32>
    %59 = tpu.matmul %48, %58, %cst_33 {dimension_numbers = #tpu.dot_dimension_numbers<[1], [0], [0], [1], [0, 0, 1, 1], [], []>} : vector<1x32xf32>, vector<32x32xf32>, vector<1x32xf32> -> vector<1x32xf32>
    %60 = arith.addf %57, %59 : vector<1x32xf32>
    %61 = vector.broadcast %60 : vector<1x32xf32> to vector<4x32xf32>
    %62 = arith.mulf %53, %61 : vector<4x32xf32>
    %cst_34 = arith.constant dense<0.000000e+00> : vector<4x16xf32>
    %63 = tpu.matmul %62, %13, %cst_34 {dimension_numbers = #tpu.dot_dimension_numbers<[1], [0], [0], [1], [0, 0, 1, 1], [], []>} : vector<4x32xf32>, vector<32x16xf32>, vector<4x16xf32> -> vector<4x16xf32>
    %cst_35 = arith.constant 0.000000e+00 : f32
    %64 = vector.broadcast %cst_35 : f32 to vector<4x16xf32>
    %65 = arith.maximumf %63, %64 : vector<4x16xf32>
    %66 = math.sqrt %65 : vector<4x16xf32>
    %cst_36 = arith.constant 0.000000e+00 : f32
    %67 = vector.broadcast %cst_36 : f32 to vector<4x16xf32>
    %68 = arith.subf %67, %63 : vector<4x16xf32>
    %cst_37 = arith.constant 0.000000e+00 : f32
    %69 = vector.broadcast %cst_37 : f32 to vector<4x16xf32>
    %70 = arith.maximumf %68, %69 : vector<4x16xf32>
    %71 = math.sqrt %70 : vector<4x16xf32>
    %72 = arith.subf %66, %71 : vector<4x16xf32>
    %73 = arith.mulf %72, %72 : vector<4x16xf32>
    %74 = vector.shape_cast %73 : vector<4x16xf32> to vector<1x4x16xf32>
    %cst_38 = arith.constant dense<0.000000e+00> : vector<1xf32>
    %75 = vector.multi_reduction <add>, %74, %cst_38 [1, 2] : vector<1x4x16xf32> to vector<1xf32>
    %76 = vector.shape_cast %75 : vector<1xf32> to vector<1x1x1xf32>
    %77 = vector.extract %76[0, 0, 0] : f32 from vector<1x1x1xf32>
    %78 = math.sqrt %77 : f32
    %cst_39 = arith.constant 9.99999996E-13 : f32
    %79 = arith.maximumf %78, %cst_39 : f32
    %80 = vector.broadcast %79 : f32 to vector<4x16xf32>
    %81 = arith.divf %72, %80 : vector<4x16xf32>
    %c0_40 = arith.constant 0 : index
    %c0_41 = arith.constant 0 : index
    %82 = vector.load %arg11[%c0_40, %c0_41] : memref<16x32xf32, #tpu.memory_space<vmem>>, vector<16x32xf32>
    %cst_42 = arith.constant dense<0.000000e+00> : vector<4x32xf32>
    %83 = tpu.matmul %81, %82, %cst_42 {dimension_numbers = #tpu.dot_dimension_numbers<[1], [0], [0], [1], [0, 0, 1, 1], [], []>} : vector<4x16xf32>, vector<16x32xf32>, vector<4x32xf32> -> vector<4x32xf32>
    %c0_43 = arith.constant 0 : index
    %c0_44 = arith.constant 0 : index
    %84 = vector.load %arg12[%c0_43, %c0_44] : memref<1x32xf32, #tpu.memory_space<vmem>>, vector<1x32xf32>
    %85 = vector.broadcast %84 : vector<1x32xf32> to vector<4x32xf32>
    %86 = arith.addf %83, %85 : vector<4x32xf32>
    %cst_45 = arith.constant 0.000000e+00 : f32
    %87 = vector.broadcast %cst_45 : f32 to vector<4x32xf32>
    %88 = arith.maximumf %86, %87 : vector<4x32xf32>
    %c0_46 = arith.constant 0 : index
    %c0_47 = arith.constant 0 : index
    %89 = vector.load %arg13[%c0_46, %c0_47] : memref<32x2xf32, #tpu.memory_space<vmem>>, vector<32x2xf32>
    %cst_48 = arith.constant dense<0.000000e+00> : vector<4x2xf32>
    %90 = tpu.matmul %88, %89, %cst_48 {dimension_numbers = #tpu.dot_dimension_numbers<[1], [0], [0], [1], [0, 0, 1, 1], [], []>} : vector<4x32xf32>, vector<32x2xf32>, vector<4x2xf32> -> vector<4x2xf32>
    %c0_49 = arith.constant 0 : index
    %c0_50 = arith.constant 0 : index
    %91 = vector.load %arg14[%c0_49, %c0_50] : memref<1x2xf32, #tpu.memory_space<vmem>>, vector<1x2xf32>
    %92 = vector.broadcast %91 : vector<1x2xf32> to vector<4x2xf32>
    %93 = arith.addf %90, %92 : vector<4x2xf32>
    %cst_51 = arith.constant dense<0xFF800000> : vector<2xf32>
    %94 = vector.multi_reduction <maximumf>, %93, %cst_51 [0] : vector<4x2xf32> to vector<2xf32>
    %95 = vector.shape_cast %94 : vector<2xf32> to vector<1x2xf32>
    %96 = vector.broadcast %95 : vector<1x2xf32> to vector<4x2xf32>
    %97 = arith.subf %93, %96 : vector<4x2xf32>
    %98 = math.exp %97 : vector<4x2xf32>
    %cst_52 = arith.constant dense<0.000000e+00> : vector<2xf32>
    %99 = vector.multi_reduction <add>, %98, %cst_52 [0] : vector<4x2xf32> to vector<2xf32>
    %100 = vector.shape_cast %99 : vector<2xf32> to vector<1x2xf32>
    %101 = vector.broadcast %100 : vector<1x2xf32> to vector<4x2xf32>
    %102 = arith.divf %98, %101 : vector<4x2xf32>
    %103 = vector.extract_strided_slice %102 {offsets = [0, 0], sizes = [4, 1], strides = [1, 1]} : vector<4x2xf32> to vector<4x1xf32>
    %104 = vector.broadcast %103 : vector<4x1xf32> to vector<4x16xf32>
    %105 = arith.mulf %104, %17 : vector<4x16xf32>
    %cst_53 = arith.constant dense<0.000000e+00> : vector<16xf32>
    %106 = vector.multi_reduction <add>, %105, %cst_53 [0] : vector<4x16xf32> to vector<16xf32>
    %107 = vector.shape_cast %106 : vector<16xf32> to vector<1x16xf32>
    %108 = vector.extract_strided_slice %102 {offsets = [0, 1], sizes = [4, 1], strides = [1, 1]} : vector<4x2xf32> to vector<4x1xf32>
    %109 = vector.broadcast %108 : vector<4x1xf32> to vector<4x16xf32>
    %110 = arith.mulf %109, %17 : vector<4x16xf32>
    %cst_54 = arith.constant dense<0.000000e+00> : vector<16xf32>
    %111 = vector.multi_reduction <add>, %110, %cst_54 [0] : vector<4x16xf32> to vector<16xf32>
    %112 = vector.shape_cast %111 : vector<16xf32> to vector<1x16xf32>
    %c0_55 = arith.constant 0 : index
    %c0_56 = arith.constant 0 : index
    %113 = vector.load %arg16[%c0_55, %c0_56] : memref<1x32xf32, #tpu.memory_space<vmem>>, vector<1x32xf32>
    %c0_57 = arith.constant 0 : index
    %c0_58 = arith.constant 0 : index
    %114 = vector.load %arg15[%c0_57, %c0_58] : memref<32x32xf32, #tpu.memory_space<vmem>>, vector<16x32xf32>
    %cst_59 = arith.constant dense<0.000000e+00> : vector<1x32xf32>
    %115 = tpu.matmul %107, %114, %cst_59 {dimension_numbers = #tpu.dot_dimension_numbers<[1], [0], [0], [1], [0, 0, 1, 1], [], []>} : vector<1x16xf32>, vector<16x32xf32>, vector<1x32xf32> -> vector<1x32xf32>
    %116 = arith.addf %113, %115 : vector<1x32xf32>
    %c16 = arith.constant 16 : index
    %c0_60 = arith.constant 0 : index
    %117 = vector.load %arg15[%c16, %c0_60] : memref<32x32xf32, #tpu.memory_space<vmem>>, vector<16x32xf32>
    %cst_61 = arith.constant dense<0.000000e+00> : vector<1x32xf32>
    %118 = tpu.matmul %112, %117, %cst_61 {dimension_numbers = #tpu.dot_dimension_numbers<[1], [0], [0], [1], [0, 0, 1, 1], [], []>} : vector<1x16xf32>, vector<16x32xf32>, vector<1x32xf32> -> vector<1x32xf32>
    %119 = arith.addf %116, %118 : vector<1x32xf32>
    %c0_62 = arith.constant 0 : index
    %c0_63 = arith.constant 0 : index
    %120 = vector.load %arg18[%c0_62, %c0_63] : memref<1x32xf32, #tpu.memory_space<vmem>>, vector<1x32xf32>
    %c0_64 = arith.constant 0 : index
    %c0_65 = arith.constant 0 : index
    %121 = vector.load %arg17[%c0_64, %c0_65] : memref<64x32xf32, #tpu.memory_space<vmem>>, vector<32x32xf32>
    %cst_66 = arith.constant dense<0.000000e+00> : vector<1x32xf32>
    %122 = tpu.matmul %43, %121, %cst_66 {dimension_numbers = #tpu.dot_dimension_numbers<[1], [0], [0], [1], [0, 0, 1, 1], [], []>} : vector<1x32xf32>, vector<32x32xf32>, vector<1x32xf32> -> vector<1x32xf32>
    %123 = arith.addf %120, %122 : vector<1x32xf32>
    %c32_67 = arith.constant 32 : index
    %c0_68 = arith.constant 0 : index
    %124 = vector.load %arg17[%c32_67, %c0_68] : memref<64x32xf32, #tpu.memory_space<vmem>>, vector<32x32xf32>
    %cst_69 = arith.constant dense<0.000000e+00> : vector<1x32xf32>
    %125 = tpu.matmul %48, %124, %cst_69 {dimension_numbers = #tpu.dot_dimension_numbers<[1], [0], [0], [1], [0, 0, 1, 1], [], []>} : vector<1x32xf32>, vector<32x32xf32>, vector<1x32xf32> -> vector<1x32xf32>
    %126 = arith.addf %123, %125 : vector<1x32xf32>
    %127 = arith.mulf %119, %126 : vector<1x32xf32>
    %cst_70 = arith.constant dense<0.000000e+00> : vector<1x16xf32>
    %128 = tpu.matmul %127, %13, %cst_70 {dimension_numbers = #tpu.dot_dimension_numbers<[1], [0], [0], [1], [0, 0, 1, 1], [], []>} : vector<1x32xf32>, vector<32x16xf32>, vector<1x16xf32> -> vector<1x16xf32>
    %cst_71 = arith.constant 0.000000e+00 : f32
    %129 = vector.broadcast %cst_71 : f32 to vector<1x16xf32>
    %130 = arith.maximumf %128, %129 : vector<1x16xf32>
    %131 = math.sqrt %130 : vector<1x16xf32>
    %cst_72 = arith.constant 0.000000e+00 : f32
    %132 = vector.broadcast %cst_72 : f32 to vector<1x16xf32>
    %133 = arith.subf %132, %128 : vector<1x16xf32>
    %cst_73 = arith.constant 0.000000e+00 : f32
    %134 = vector.broadcast %cst_73 : f32 to vector<1x16xf32>
    %135 = arith.maximumf %133, %134 : vector<1x16xf32>
    %136 = math.sqrt %135 : vector<1x16xf32>
    %137 = arith.subf %131, %136 : vector<1x16xf32>
    %138 = arith.mulf %137, %137 : vector<1x16xf32>
    %139 = vector.shape_cast %138 : vector<1x16xf32> to vector<1x1x16xf32>
    %cst_74 = arith.constant dense<0.000000e+00> : vector<1xf32>
    %140 = vector.multi_reduction <add>, %139, %cst_74 [1, 2] : vector<1x1x16xf32> to vector<1xf32>
    %141 = vector.shape_cast %140 : vector<1xf32> to vector<1x1x1xf32>
    %142 = vector.extract %141[0, 0, 0] : f32 from vector<1x1x1xf32>
    %143 = math.sqrt %142 : f32
    %cst_75 = arith.constant 9.99999996E-13 : f32
    %144 = arith.maximumf %143, %cst_75 : f32
    %145 = vector.broadcast %144 : f32 to vector<1x16xf32>
    %146 = arith.divf %137, %145 : vector<1x16xf32>
    %c0_76 = arith.constant 0 : index
    %c0_77 = arith.constant 0 : index
    %147 = vector.load %arg20[%c0_76, %c0_77] : memref<1x32xf32, #tpu.memory_space<vmem>>, vector<1x32xf32>
    %c0_78 = arith.constant 0 : index
    %c0_79 = arith.constant 0 : index
    %148 = vector.load %arg19[%c0_78, %c0_79] : memref<32x32xf32, #tpu.memory_space<vmem>>, vector<16x32xf32>
    %cst_80 = arith.constant dense<0.000000e+00> : vector<1x32xf32>
    %149 = tpu.matmul %107, %148, %cst_80 {dimension_numbers = #tpu.dot_dimension_numbers<[1], [0], [0], [1], [0, 0, 1, 1], [], []>} : vector<1x16xf32>, vector<16x32xf32>, vector<1x32xf32> -> vector<1x32xf32>
    %150 = arith.addf %147, %149 : vector<1x32xf32>
    %c16_81 = arith.constant 16 : index
    %c0_82 = arith.constant 0 : index
    %151 = vector.load %arg19[%c16_81, %c0_82] : memref<32x32xf32, #tpu.memory_space<vmem>>, vector<16x32xf32>
    %cst_83 = arith.constant dense<0.000000e+00> : vector<1x32xf32>
    %152 = tpu.matmul %112, %151, %cst_83 {dimension_numbers = #tpu.dot_dimension_numbers<[1], [0], [0], [1], [0, 0, 1, 1], [], []>} : vector<1x16xf32>, vector<16x32xf32>, vector<1x32xf32> -> vector<1x32xf32>
    %153 = arith.addf %150, %152 : vector<1x32xf32>
    %c0_84 = arith.constant 0 : index
    %c0_85 = arith.constant 0 : index
    %154 = vector.load %arg22[%c0_84, %c0_85] : memref<1x32xf32, #tpu.memory_space<vmem>>, vector<1x32xf32>
    %c0_86 = arith.constant 0 : index
    %c0_87 = arith.constant 0 : index
    %155 = vector.load %arg21[%c0_86, %c0_87] : memref<64x32xf32, #tpu.memory_space<vmem>>, vector<32x32xf32>
    %cst_88 = arith.constant dense<0.000000e+00> : vector<1x32xf32>
    %156 = tpu.matmul %43, %155, %cst_88 {dimension_numbers = #tpu.dot_dimension_numbers<[1], [0], [0], [1], [0, 0, 1, 1], [], []>} : vector<1x32xf32>, vector<32x32xf32>, vector<1x32xf32> -> vector<1x32xf32>
    %157 = arith.addf %154, %156 : vector<1x32xf32>
    %c32_89 = arith.constant 32 : index
    %c0_90 = arith.constant 0 : index
    %158 = vector.load %arg21[%c32_89, %c0_90] : memref<64x32xf32, #tpu.memory_space<vmem>>, vector<32x32xf32>
    %cst_91 = arith.constant dense<0.000000e+00> : vector<1x32xf32>
    %159 = tpu.matmul %48, %158, %cst_91 {dimension_numbers = #tpu.dot_dimension_numbers<[1], [0], [0], [1], [0, 0, 1, 1], [], []>} : vector<1x32xf32>, vector<32x32xf32>, vector<1x32xf32> -> vector<1x32xf32>
    %160 = arith.addf %157, %159 : vector<1x32xf32>
    %161 = arith.mulf %153, %160 : vector<1x32xf32>
    %162 = arith.mulf %161, %127 : vector<1x32xf32>
    %cst_92 = arith.constant dense<0.000000e+00> : vector<1x16xf32>
    %163 = tpu.matmul %162, %13, %cst_92 {dimension_numbers = #tpu.dot_dimension_numbers<[1], [0], [0], [1], [0, 0, 1, 1], [], []>} : vector<1x32xf32>, vector<32x16xf32>, vector<1x16xf32> -> vector<1x16xf32>
    %cst_93 = arith.constant 0.000000e+00 : f32
    %164 = vector.broadcast %cst_93 : f32 to vector<1x16xf32>
    %165 = arith.maximumf %163, %164 : vector<1x16xf32>
    %166 = math.sqrt %165 : vector<1x16xf32>
    %cst_94 = arith.constant 0.000000e+00 : f32
    %167 = vector.broadcast %cst_94 : f32 to vector<1x16xf32>
    %168 = arith.subf %167, %163 : vector<1x16xf32>
    %cst_95 = arith.constant 0.000000e+00 : f32
    %169 = vector.broadcast %cst_95 : f32 to vector<1x16xf32>
    %170 = arith.maximumf %168, %169 : vector<1x16xf32>
    %171 = math.sqrt %170 : vector<1x16xf32>
    %172 = arith.subf %166, %171 : vector<1x16xf32>
    %173 = arith.mulf %172, %172 : vector<1x16xf32>
    %174 = vector.shape_cast %173 : vector<1x16xf32> to vector<1x1x16xf32>
    %cst_96 = arith.constant dense<0.000000e+00> : vector<1xf32>
    %175 = vector.multi_reduction <add>, %174, %cst_96 [1, 2] : vector<1x1x16xf32> to vector<1xf32>
    %176 = vector.shape_cast %175 : vector<1xf32> to vector<1x1x1xf32>
    %177 = vector.extract %176[0, 0, 0] : f32 from vector<1x1x1xf32>
    %178 = math.sqrt %177 : f32
    %cst_97 = arith.constant 9.99999996E-13 : f32
    %179 = arith.maximumf %178, %cst_97 : f32
    %180 = vector.broadcast %179 : f32 to vector<1x16xf32>
    %181 = arith.divf %172, %180 : vector<1x16xf32>
    %c0_98 = arith.constant 0 : index
    %c0_99 = arith.constant 0 : index
    %182 = vector.load %arg23[%c0_98, %c0_99] : memref<2x32xf32, #tpu.memory_space<vmem>>, vector<1x16xf32>
    tpu.vector_store %arg23[%c0_98, %c0_99], %146 {strides = array<i32>} : memref<2x32xf32, #tpu.memory_space<vmem>>, vector<1x16xf32>,
    %c0_100 = arith.constant 0 : index
    %c16_101 = arith.constant 16 : index
    %183 = vector.load %arg23[%c0_100, %c16_101] : memref<2x32xf32, #tpu.memory_space<vmem>>, vector<1x16xf32>
    tpu.vector_store %arg23[%c0_100, %c16_101], %181 {strides = array<i32>} : memref<2x32xf32, #tpu.memory_space<vmem>>, vector<1x16xf32>,
    %c1 = arith.constant 1 : index
    %c0_102 = arith.constant 0 : index
    %c0_103 = arith.constant 0 : index
    %184 = vector.load %arg1[%c1, %c0_102, %c0_103] : memref<2x8x32xf32, #tpu.memory_space<vmem>>, vector<1x8x32xf32>
    %185 = vector.shape_cast %184 : vector<1x8x32xf32> to vector<8x32xf32>
    %c1_104 = arith.constant 1 : index
    %c0_105 = arith.constant 0 : index
    %c0_106 = arith.constant 0 : index
    %186 = vector.load %arg2[%c1_104, %c0_105, %c0_106] : memref<2x4x16xf32, #tpu.memory_space<vmem>>, vector<1x4x16xf32>
    %187 = vector.shape_cast %186 : vector<1x4x16xf32> to vector<4x16xf32>
    %c0_107 = arith.constant 0 : index
    %c0_108 = arith.constant 0 : index
    %188 = vector.load %arg3[%c0_107, %c0_108] : memref<32x32xf32, #tpu.memory_space<vmem>>, vector<32x32xf32>
    %cst_109 = arith.constant dense<0.000000e+00> : vector<8x32xf32>
    %189 = tpu.matmul %185, %188, %cst_109 {dimension_numbers = #tpu.dot_dimension_numbers<[1], [0], [0], [1], [0, 0, 1, 1], [], []>} : vector<8x32xf32>, vector<32x32xf32>, vector<8x32xf32> -> vector<8x32xf32>
    %c0_110 = arith.constant 0 : index
    %c0_111 = arith.constant 0 : index
    %190 = vector.load %arg4[%c0_110, %c0_111] : memref<1x32xf32, #tpu.memory_space<vmem>>, vector<1x32xf32>
    %191 = vector.broadcast %190 : vector<1x32xf32> to vector<8x32xf32>
    %192 = arith.addf %189, %191 : vector<8x32xf32>
    %cst_112 = arith.constant 0.000000e+00 : f32
    %193 = vector.broadcast %cst_112 : f32 to vector<8x32xf32>
    %194 = arith.maximumf %192, %193 : vector<8x32xf32>
    %c0_113 = arith.constant 0 : index
    %c0_114 = arith.constant 0 : index
    %195 = vector.load %arg5[%c0_113, %c0_114] : memref<32x2xf32, #tpu.memory_space<vmem>>, vector<32x2xf32>
    %cst_115 = arith.constant dense<0.000000e+00> : vector<8x2xf32>
    %196 = tpu.matmul %194, %195, %cst_115 {dimension_numbers = #tpu.dot_dimension_numbers<[1], [0], [0], [1], [0, 0, 1, 1], [], []>} : vector<8x32xf32>, vector<32x2xf32>, vector<8x2xf32> -> vector<8x2xf32>
    %c0_116 = arith.constant 0 : index
    %c0_117 = arith.constant 0 : index
    %197 = vector.load %arg6[%c0_116, %c0_117] : memref<1x2xf32, #tpu.memory_space<vmem>>, vector<1x2xf32>
    %198 = vector.broadcast %197 : vector<1x2xf32> to vector<8x2xf32>
    %199 = arith.addf %196, %198 : vector<8x2xf32>
    %cst_118 = arith.constant dense<0xFF800000> : vector<2xf32>
    %200 = vector.multi_reduction <maximumf>, %199, %cst_118 [0] : vector<8x2xf32> to vector<2xf32>
    %201 = vector.shape_cast %200 : vector<2xf32> to vector<1x2xf32>
    %202 = vector.broadcast %201 : vector<1x2xf32> to vector<8x2xf32>
    %203 = arith.subf %199, %202 : vector<8x2xf32>
    %204 = math.exp %203 : vector<8x2xf32>
    %cst_119 = arith.constant dense<0.000000e+00> : vector<2xf32>
    %205 = vector.multi_reduction <add>, %204, %cst_119 [0] : vector<8x2xf32> to vector<2xf32>
    %206 = vector.shape_cast %205 : vector<2xf32> to vector<1x2xf32>
    %207 = vector.broadcast %206 : vector<1x2xf32> to vector<8x2xf32>
    %208 = arith.divf %204, %207 : vector<8x2xf32>
    %209 = vector.extract_strided_slice %208 {offsets = [0, 0], sizes = [8, 1], strides = [1, 1]} : vector<8x2xf32> to vector<8x1xf32>
    %210 = vector.broadcast %209 : vector<8x1xf32> to vector<8x32xf32>
    %211 = arith.mulf %210, %185 : vector<8x32xf32>
    %cst_120 = arith.constant dense<0.000000e+00> : vector<32xf32>
    %212 = vector.multi_reduction <add>, %211, %cst_120 [0] : vector<8x32xf32> to vector<32xf32>
    %213 = vector.shape_cast %212 : vector<32xf32> to vector<1x32xf32>
    %214 = vector.extract_strided_slice %208 {offsets = [0, 1], sizes = [8, 1], strides = [1, 1]} : vector<8x2xf32> to vector<8x1xf32>
    %215 = vector.broadcast %214 : vector<8x1xf32> to vector<8x32xf32>
    %216 = arith.mulf %215, %185 : vector<8x32xf32>
    %cst_121 = arith.constant dense<0.000000e+00> : vector<32xf32>
    %217 = vector.multi_reduction <add>, %216, %cst_121 [0] : vector<8x32xf32> to vector<32xf32>
    %218 = vector.shape_cast %217 : vector<32xf32> to vector<1x32xf32>
    %c0_122 = arith.constant 0 : index
    %c0_123 = arith.constant 0 : index
    %219 = vector.load %arg7[%c0_122, %c0_123] : memref<16x32xf32, #tpu.memory_space<vmem>>, vector<16x32xf32>
    %cst_124 = arith.constant dense<0.000000e+00> : vector<4x32xf32>
    %220 = tpu.matmul %187, %219, %cst_124 {dimension_numbers = #tpu.dot_dimension_numbers<[1], [0], [0], [1], [0, 0, 1, 1], [], []>} : vector<4x16xf32>, vector<16x32xf32>, vector<4x32xf32> -> vector<4x32xf32>
    %c0_125 = arith.constant 0 : index
    %c0_126 = arith.constant 0 : index
    %221 = vector.load %arg8[%c0_125, %c0_126] : memref<1x32xf32, #tpu.memory_space<vmem>>, vector<1x32xf32>
    %222 = vector.broadcast %221 : vector<1x32xf32> to vector<4x32xf32>
    %223 = arith.addf %220, %222 : vector<4x32xf32>
    %c0_127 = arith.constant 0 : index
    %c0_128 = arith.constant 0 : index
    %224 = vector.load %arg10[%c0_127, %c0_128] : memref<1x32xf32, #tpu.memory_space<vmem>>, vector<1x32xf32>
    %c0_129 = arith.constant 0 : index
    %c0_130 = arith.constant 0 : index
    %225 = vector.load %arg9[%c0_129, %c0_130] : memref<64x32xf32, #tpu.memory_space<vmem>>, vector<32x32xf32>
    %cst_131 = arith.constant dense<0.000000e+00> : vector<1x32xf32>
    %226 = tpu.matmul %213, %225, %cst_131 {dimension_numbers = #tpu.dot_dimension_numbers<[1], [0], [0], [1], [0, 0, 1, 1], [], []>} : vector<1x32xf32>, vector<32x32xf32>, vector<1x32xf32> -> vector<1x32xf32>
    %227 = arith.addf %224, %226 : vector<1x32xf32>
    %c32_132 = arith.constant 32 : index
    %c0_133 = arith.constant 0 : index
    %228 = vector.load %arg9[%c32_132, %c0_133] : memref<64x32xf32, #tpu.memory_space<vmem>>, vector<32x32xf32>
    %cst_134 = arith.constant dense<0.000000e+00> : vector<1x32xf32>
    %229 = tpu.matmul %218, %228, %cst_134 {dimension_numbers = #tpu.dot_dimension_numbers<[1], [0], [0], [1], [0, 0, 1, 1], [], []>} : vector<1x32xf32>, vector<32x32xf32>, vector<1x32xf32> -> vector<1x32xf32>
    %230 = arith.addf %227, %229 : vector<1x32xf32>
    %231 = vector.broadcast %230 : vector<1x32xf32> to vector<4x32xf32>
    %232 = arith.mulf %223, %231 : vector<4x32xf32>
    %cst_135 = arith.constant dense<0.000000e+00> : vector<4x16xf32>
    %233 = tpu.matmul %232, %13, %cst_135 {dimension_numbers = #tpu.dot_dimension_numbers<[1], [0], [0], [1], [0, 0, 1, 1], [], []>} : vector<4x32xf32>, vector<32x16xf32>, vector<4x16xf32> -> vector<4x16xf32>
    %cst_136 = arith.constant 0.000000e+00 : f32
    %234 = vector.broadcast %cst_136 : f32 to vector<4x16xf32>
    %235 = arith.maximumf %233, %234 : vector<4x16xf32>
    %236 = math.sqrt %235 : vector<4x16xf32>
    %cst_137 = arith.constant 0.000000e+00 : f32
    %237 = vector.broadcast %cst_137 : f32 to vector<4x16xf32>
    %238 = arith.subf %237, %233 : vector<4x16xf32>
    %cst_138 = arith.constant 0.000000e+00 : f32
    %239 = vector.broadcast %cst_138 : f32 to vector<4x16xf32>
    %240 = arith.maximumf %238, %239 : vector<4x16xf32>
    %241 = math.sqrt %240 : vector<4x16xf32>
    %242 = arith.subf %236, %241 : vector<4x16xf32>
    %243 = arith.mulf %242, %242 : vector<4x16xf32>
    %244 = vector.shape_cast %243 : vector<4x16xf32> to vector<1x4x16xf32>
    %cst_139 = arith.constant dense<0.000000e+00> : vector<1xf32>
    %245 = vector.multi_reduction <add>, %244, %cst_139 [1, 2] : vector<1x4x16xf32> to vector<1xf32>
    %246 = vector.shape_cast %245 : vector<1xf32> to vector<1x1x1xf32>
    %247 = vector.extract %246[0, 0, 0] : f32 from vector<1x1x1xf32>
    %248 = math.sqrt %247 : f32
    %cst_140 = arith.constant 9.99999996E-13 : f32
    %249 = arith.maximumf %248, %cst_140 : f32
    %250 = vector.broadcast %249 : f32 to vector<4x16xf32>
    %251 = arith.divf %242, %250 : vector<4x16xf32>
    %c0_141 = arith.constant 0 : index
    %c0_142 = arith.constant 0 : index
    %252 = vector.load %arg11[%c0_141, %c0_142] : memref<16x32xf32, #tpu.memory_space<vmem>>, vector<16x32xf32>
    %cst_143 = arith.constant dense<0.000000e+00> : vector<4x32xf32>
    %253 = tpu.matmul %251, %252, %cst_143 {dimension_numbers = #tpu.dot_dimension_numbers<[1], [0], [0], [1], [0, 0, 1, 1], [], []>} : vector<4x16xf32>, vector<16x32xf32>, vector<4x32xf32> -> vector<4x32xf32>
    %c0_144 = arith.constant 0 : index
    %c0_145 = arith.constant 0 : index
    %254 = vector.load %arg12[%c0_144, %c0_145] : memref<1x32xf32, #tpu.memory_space<vmem>>, vector<1x32xf32>
    %255 = vector.broadcast %254 : vector<1x32xf32> to vector<4x32xf32>
    %256 = arith.addf %253, %255 : vector<4x32xf32>
    %cst_146 = arith.constant 0.000000e+00 : f32
    %257 = vector.broadcast %cst_146 : f32 to vector<4x32xf32>
    %258 = arith.maximumf %256, %257 : vector<4x32xf32>
    %c0_147 = arith.constant 0 : index
    %c0_148 = arith.constant 0 : index
    %259 = vector.load %arg13[%c0_147, %c0_148] : memref<32x2xf32, #tpu.memory_space<vmem>>, vector<32x2xf32>
    %cst_149 = arith.constant dense<0.000000e+00> : vector<4x2xf32>
    %260 = tpu.matmul %258, %259, %cst_149 {dimension_numbers = #tpu.dot_dimension_numbers<[1], [0], [0], [1], [0, 0, 1, 1], [], []>} : vector<4x32xf32>, vector<32x2xf32>, vector<4x2xf32> -> vector<4x2xf32>
    %c0_150 = arith.constant 0 : index
    %c0_151 = arith.constant 0 : index
    %261 = vector.load %arg14[%c0_150, %c0_151] : memref<1x2xf32, #tpu.memory_space<vmem>>, vector<1x2xf32>
    %262 = vector.broadcast %261 : vector<1x2xf32> to vector<4x2xf32>
    %263 = arith.addf %260, %262 : vector<4x2xf32>
    %cst_152 = arith.constant dense<0xFF800000> : vector<2xf32>
    %264 = vector.multi_reduction <maximumf>, %263, %cst_152 [0] : vector<4x2xf32> to vector<2xf32>
    %265 = vector.shape_cast %264 : vector<2xf32> to vector<1x2xf32>
    %266 = vector.broadcast %265 : vector<1x2xf32> to vector<4x2xf32>
    %267 = arith.subf %263, %266 : vector<4x2xf32>
    %268 = math.exp %267 : vector<4x2xf32>
    %cst_153 = arith.constant dense<0.000000e+00> : vector<2xf32>
    %269 = vector.multi_reduction <add>, %268, %cst_153 [0] : vector<4x2xf32> to vector<2xf32>
    %270 = vector.shape_cast %269 : vector<2xf32> to vector<1x2xf32>
    %271 = vector.broadcast %270 : vector<1x2xf32> to vector<4x2xf32>
    %272 = arith.divf %268, %271 : vector<4x2xf32>
    %273 = vector.extract_strided_slice %272 {offsets = [0, 0], sizes = [4, 1], strides = [1, 1]} : vector<4x2xf32> to vector<4x1xf32>
    %274 = vector.broadcast %273 : vector<4x1xf32> to vector<4x16xf32>
    %275 = arith.mulf %274, %187 : vector<4x16xf32>
    %cst_154 = arith.constant dense<0.000000e+00> : vector<16xf32>
    %276 = vector.multi_reduction <add>, %275, %cst_154 [0] : vector<4x16xf32> to vector<16xf32>
    %277 = vector.shape_cast %276 : vector<16xf32> to vector<1x16xf32>
    %278 = vector.extract_strided_slice %272 {offsets = [0, 1], sizes = [4, 1], strides = [1, 1]} : vector<4x2xf32> to vector<4x1xf32>
    %279 = vector.broadcast %278 : vector<4x1xf32> to vector<4x16xf32>
    %280 = arith.mulf %279, %187 : vector<4x16xf32>
    %cst_155 = arith.constant dense<0.000000e+00> : vector<16xf32>
    %281 = vector.multi_reduction <add>, %280, %cst_155 [0] : vector<4x16xf32> to vector<16xf32>
    %282 = vector.shape_cast %281 : vector<16xf32> to vector<1x16xf32>
    %c0_156 = arith.constant 0 : index
    %c0_157 = arith.constant 0 : index
    %283 = vector.load %arg16[%c0_156, %c0_157] : memref<1x32xf32, #tpu.memory_space<vmem>>, vector<1x32xf32>
    %c0_158 = arith.constant 0 : index
    %c0_159 = arith.constant 0 : index
    %284 = vector.load %arg15[%c0_158, %c0_159] : memref<32x32xf32, #tpu.memory_space<vmem>>, vector<16x32xf32>
    %cst_160 = arith.constant dense<0.000000e+00> : vector<1x32xf32>
    %285 = tpu.matmul %277, %284, %cst_160 {dimension_numbers = #tpu.dot_dimension_numbers<[1], [0], [0], [1], [0, 0, 1, 1], [], []>} : vector<1x16xf32>, vector<16x32xf32>, vector<1x32xf32> -> vector<1x32xf32>
    %286 = arith.addf %283, %285 : vector<1x32xf32>
    %c16_161 = arith.constant 16 : index
    %c0_162 = arith.constant 0 : index
    %287 = vector.load %arg15[%c16_161, %c0_162] : memref<32x32xf32, #tpu.memory_space<vmem>>, vector<16x32xf32>
    %cst_163 = arith.constant dense<0.000000e+00> : vector<1x32xf32>
    %288 = tpu.matmul %282, %287, %cst_163 {dimension_numbers = #tpu.dot_dimension_numbers<[1], [0], [0], [1], [0, 0, 1, 1], [], []>} : vector<1x16xf32>, vector<16x32xf32>, vector<1x32xf32> -> vector<1x32xf32>
    %289 = arith.addf %286, %288 : vector<1x32xf32>
    %c0_164 = arith.constant 0 : index
    %c0_165 = arith.constant 0 : index
    %290 = vector.load %arg18[%c0_164, %c0_165] : memref<1x32xf32, #tpu.memory_space<vmem>>, vector<1x32xf32>
    %c0_166 = arith.constant 0 : index
    %c0_167 = arith.constant 0 : index
    %291 = vector.load %arg17[%c0_166, %c0_167] : memref<64x32xf32, #tpu.memory_space<vmem>>, vector<32x32xf32>
    %cst_168 = arith.constant dense<0.000000e+00> : vector<1x32xf32>
    %292 = tpu.matmul %213, %291, %cst_168 {dimension_numbers = #tpu.dot_dimension_numbers<[1], [0], [0], [1], [0, 0, 1, 1], [], []>} : vector<1x32xf32>, vector<32x32xf32>, vector<1x32xf32> -> vector<1x32xf32>
    %293 = arith.addf %290, %292 : vector<1x32xf32>
    %c32_169 = arith.constant 32 : index
    %c0_170 = arith.constant 0 : index
    %294 = vector.load %arg17[%c32_169, %c0_170] : memref<64x32xf32, #tpu.memory_space<vmem>>, vector<32x32xf32>
    %cst_171 = arith.constant dense<0.000000e+00> : vector<1x32xf32>
    %295 = tpu.matmul %218, %294, %cst_171 {dimension_numbers = #tpu.dot_dimension_numbers<[1], [0], [0], [1], [0, 0, 1, 1], [], []>} : vector<1x32xf32>, vector<32x32xf32>, vector<1x32xf32> -> vector<1x32xf32>
    %296 = arith.addf %293, %295 : vector<1x32xf32>
    %297 = arith.mulf %289, %296 : vector<1x32xf32>
    %cst_172 = arith.constant dense<0.000000e+00> : vector<1x16xf32>
    %298 = tpu.matmul %297, %13, %cst_172 {dimension_numbers = #tpu.dot_dimension_numbers<[1], [0], [0], [1], [0, 0, 1, 1], [], []>} : vector<1x32xf32>, vector<32x16xf32>, vector<1x16xf32> -> vector<1x16xf32>
    %cst_173 = arith.constant 0.000000e+00 : f32
    %299 = vector.broadcast %cst_173 : f32 to vector<1x16xf32>
    %300 = arith.maximumf %298, %299 : vector<1x16xf32>
    %301 = math.sqrt %300 : vector<1x16xf32>
    %cst_174 = arith.constant 0.000000e+00 : f32
    %302 = vector.broadcast %cst_174 : f32 to vector<1x16xf32>
    %303 = arith.subf %302, %298 : vector<1x16xf32>
    %cst_175 = arith.constant 0.000000e+00 : f32
    %304 = vector.broadcast %cst_175 : f32 to vector<1x16xf32>
    %305 = arith.maximumf %303, %304 : vector<1x16xf32>
    %306 = math.sqrt %305 : vector<1x16xf32>
    %307 = arith.subf %301, %306 : vector<1x16xf32>
    %308 = arith.mulf %307, %307 : vector<1x16xf32>
    %309 = vector.shape_cast %308 : vector<1x16xf32> to vector<1x1x16xf32>
    %cst_176 = arith.constant dense<0.000000e+00> : vector<1xf32>
    %310 = vector.multi_reduction <add>, %309, %cst_176 [1, 2] : vector<1x1x16xf32> to vector<1xf32>
    %311 = vector.shape_cast %310 : vector<1xf32> to vector<1x1x1xf32>
    %312 = vector.extract %311[0, 0, 0] : f32 from vector<1x1x1xf32>
    %313 = math.sqrt %312 : f32
    %cst_177 = arith.constant 9.99999996E-13 : f32
    %314 = arith.maximumf %313, %cst_177 : f32
    %315 = vector.broadcast %314 : f32 to vector<1x16xf32>
    %316 = arith.divf %307, %315 : vector<1x16xf32>
    %c0_178 = arith.constant 0 : index
    %c0_179 = arith.constant 0 : index
    %317 = vector.load %arg20[%c0_178, %c0_179] : memref<1x32xf32, #tpu.memory_space<vmem>>, vector<1x32xf32>
    %c0_180 = arith.constant 0 : index
    %c0_181 = arith.constant 0 : index
    %318 = vector.load %arg19[%c0_180, %c0_181] : memref<32x32xf32, #tpu.memory_space<vmem>>, vector<16x32xf32>
    %cst_182 = arith.constant dense<0.000000e+00> : vector<1x32xf32>
    %319 = tpu.matmul %277, %318, %cst_182 {dimension_numbers = #tpu.dot_dimension_numbers<[1], [0], [0], [1], [0, 0, 1, 1], [], []>} : vector<1x16xf32>, vector<16x32xf32>, vector<1x32xf32> -> vector<1x32xf32>
    %320 = arith.addf %317, %319 : vector<1x32xf32>
    %c16_183 = arith.constant 16 : index
    %c0_184 = arith.constant 0 : index
    %321 = vector.load %arg19[%c16_183, %c0_184] : memref<32x32xf32, #tpu.memory_space<vmem>>, vector<16x32xf32>
    %cst_185 = arith.constant dense<0.000000e+00> : vector<1x32xf32>
    %322 = tpu.matmul %282, %321, %cst_185 {dimension_numbers = #tpu.dot_dimension_numbers<[1], [0], [0], [1], [0, 0, 1, 1], [], []>} : vector<1x16xf32>, vector<16x32xf32>, vector<1x32xf32> -> vector<1x32xf32>
    %323 = arith.addf %320, %322 : vector<1x32xf32>
    %c0_186 = arith.constant 0 : index
    %c0_187 = arith.constant 0 : index
    %324 = vector.load %arg22[%c0_186, %c0_187] : memref<1x32xf32, #tpu.memory_space<vmem>>, vector<1x32xf32>
    %c0_188 = arith.constant 0 : index
    %c0_189 = arith.constant 0 : index
    %325 = vector.load %arg21[%c0_188, %c0_189] : memref<64x32xf32, #tpu.memory_space<vmem>>, vector<32x32xf32>
    %cst_190 = arith.constant dense<0.000000e+00> : vector<1x32xf32>
    %326 = tpu.matmul %213, %325, %cst_190 {dimension_numbers = #tpu.dot_dimension_numbers<[1], [0], [0], [1], [0, 0, 1, 1], [], []>} : vector<1x32xf32>, vector<32x32xf32>, vector<1x32xf32> -> vector<1x32xf32>
    %327 = arith.addf %324, %326 : vector<1x32xf32>
    %c32_191 = arith.constant 32 : index
    %c0_192 = arith.constant 0 : index
    %328 = vector.load %arg21[%c32_191, %c0_192] : memref<64x32xf32, #tpu.memory_space<vmem>>, vector<32x32xf32>
    %cst_193 = arith.constant dense<0.000000e+00> : vector<1x32xf32>
    %329 = tpu.matmul %218, %328, %cst_193 {dimension_numbers = #tpu.dot_dimension_numbers<[1], [0], [0], [1], [0, 0, 1, 1], [], []>} : vector<1x32xf32>, vector<32x32xf32>, vector<1x32xf32> -> vector<1x32xf32>
    %330 = arith.addf %327, %329 : vector<1x32xf32>
    %331 = arith.mulf %323, %330 : vector<1x32xf32>
    %332 = arith.mulf %331, %297 : vector<1x32xf32>
    %cst_194 = arith.constant dense<0.000000e+00> : vector<1x16xf32>
    %333 = tpu.matmul %332, %13, %cst_194 {dimension_numbers = #tpu.dot_dimension_numbers<[1], [0], [0], [1], [0, 0, 1, 1], [], []>} : vector<1x32xf32>, vector<32x16xf32>, vector<1x16xf32> -> vector<1x16xf32>
    %cst_195 = arith.constant 0.000000e+00 : f32
    %334 = vector.broadcast %cst_195 : f32 to vector<1x16xf32>
    %335 = arith.maximumf %333, %334 : vector<1x16xf32>
    %336 = math.sqrt %335 : vector<1x16xf32>
    %cst_196 = arith.constant 0.000000e+00 : f32
    %337 = vector.broadcast %cst_196 : f32 to vector<1x16xf32>
    %338 = arith.subf %337, %333 : vector<1x16xf32>
    %cst_197 = arith.constant 0.000000e+00 : f32
    %339 = vector.broadcast %cst_197 : f32 to vector<1x16xf32>
    %340 = arith.maximumf %338, %339 : vector<1x16xf32>
    %341 = math.sqrt %340 : vector<1x16xf32>
    %342 = arith.subf %336, %341 : vector<1x16xf32>
    %343 = arith.mulf %342, %342 : vector<1x16xf32>
    %344 = vector.shape_cast %343 : vector<1x16xf32> to vector<1x1x16xf32>
    %cst_198 = arith.constant dense<0.000000e+00> : vector<1xf32>
    %345 = vector.multi_reduction <add>, %344, %cst_198 [1, 2] : vector<1x1x16xf32> to vector<1xf32>
    %346 = vector.shape_cast %345 : vector<1xf32> to vector<1x1x1xf32>
    %347 = vector.extract %346[0, 0, 0] : f32 from vector<1x1x1xf32>
    %348 = math.sqrt %347 : f32
    %cst_199 = arith.constant 9.99999996E-13 : f32
    %349 = arith.maximumf %348, %cst_199 : f32
    %350 = vector.broadcast %349 : f32 to vector<1x16xf32>
    %351 = arith.divf %342, %350 : vector<1x16xf32>
    %c1_200 = arith.constant 1 : index
    %c0_201 = arith.constant 0 : index
    %352 = vector.load %arg23[%c1_200, %c0_201] : memref<2x32xf32, #tpu.memory_space<vmem>>, vector<1x16xf32>
    tpu.vector_store %arg23[%c1_200, %c0_201], %316 {strides = array<i32>} : memref<2x32xf32, #tpu.memory_space<vmem>>, vector<1x16xf32>,
    %c1_202 = arith.constant 1 : index
    %c16_203 = arith.constant 16 : index
    %353 = vector.load %arg23[%c1_202, %c16_203] : memref<2x32xf32, #tpu.memory_space<vmem>>, vector<1x16xf32>
    tpu.vector_store %arg23[%c1_202, %c16_203], %351 {strides = array<i32>} : memref<2x32xf32, #tpu.memory_space<vmem>>, vector<1x16xf32>,
    return
  }
  func.func @transform_0(%arg0: i32) -> (i32, i32, i32) {
    %c0_i32 = arith.constant 0 : i32
    %c0_i32_0 = arith.constant 0 : i32
    %c0_i32_1 = arith.constant 0 : i32
    %c0_i32_2 = arith.constant 0 : i32
    return %c0_i32, %c0_i32_0, %c0_i32_1 : i32, i32, i32
  }
  func.func @transform_1(%arg0: i32) -> (i32, i32, i32) {
    %c0_i32 = arith.constant 0 : i32
    %c0_i32_0 = arith.constant 0 : i32
    %c0_i32_1 = arith.constant 0 : i32
    %c0_i32_2 = arith.constant 0 : i32
    return %c0_i32, %c0_i32_0, %c0_i32_1 : i32, i32, i32
  }
  func.func @transform_2(%arg0: i32) -> (i32, i32) {
    %c0_i32 = arith.constant 0 : i32
    %c0_i32_0 = arith.constant 0 : i32
    %c0_i32_1 = arith.constant 0 : i32
    return %c0_i32, %c0_i32_0 : i32, i32
  }
  func.func @transform_3(%arg0: i32) -> (i32, i32) {
    %c0_i32 = arith.constant 0 : i32
    %c0_i32_0 = arith.constant 0 : i32
    %c0_i32_1 = arith.constant 0 : i32
    return %c0_i32, %c0_i32_0 : i32, i32
  }
  func.func @transform_4(%arg0: i32) -> (i32, i32) {
    %c0_i32 = arith.constant 0 : i32
    %c0_i32_0 = arith.constant 0 : i32
    %c0_i32_1 = arith.constant 0 : i32
    return %c0_i32, %c0_i32_0 : i32, i32
  }
  func.func @transform_5(%arg0: i32) -> (i32, i32) {
    %c0_i32 = arith.constant 0 : i32
    %c0_i32_0 = arith.constant 0 : i32
    %c0_i32_1 = arith.constant 0 : i32
    return %c0_i32, %c0_i32_0 : i32, i32
  }
  func.func @transform_6(%arg0: i32) -> (i32, i32) {
    %c0_i32 = arith.constant 0 : i32
    %c0_i32_0 = arith.constant 0 : i32
    %c0_i32_1 = arith.constant 0 : i32
    return %c0_i32, %c0_i32_0 : i32, i32
  }
  func.func @transform_7(%arg0: i32) -> (i32, i32) {
    %c0_i32 = arith.constant 0 : i32
    %c0_i32_0 = arith.constant 0 : i32
    %c0_i32_1 = arith.constant 0 : i32
    return %c0_i32, %c0_i32_0 : i32, i32
  }
  func.func @transform_8(%arg0: i32) -> (i32, i32) {
    %c0_i32 = arith.constant 0 : i32
    %c0_i32_0 = arith.constant 0 : i32
    %c0_i32_1 = arith.constant 0 : i32
    return %c0_i32, %c0_i32_0 : i32, i32
  }
  func.func @transform_9(%arg0: i32) -> (i32, i32) {
    %c0_i32 = arith.constant 0 : i32
    %c0_i32_0 = arith.constant 0 : i32
    %c0_i32_1 = arith.constant 0 : i32
    return %c0_i32, %c0_i32_0 : i32, i32
  }
  func.func @transform_10(%arg0: i32) -> (i32, i32) {
    %c0_i32 = arith.constant 0 : i32
    %c0_i32_0 = arith.constant 0 : i32
    %c0_i32_1 = arith.constant 0 : i32
    return %c0_i32, %c0_i32_0 : i32, i32
  }
  func.func @transform_11(%arg0: i32) -> (i32, i32) {
    %c0_i32 = arith.constant 0 : i32
    %c0_i32_0 = arith.constant 0 : i32
    %c0_i32_1 = arith.constant 0 : i32
    return %c0_i32, %c0_i32_0 : i32, i32
  }
  func.func @transform_12(%arg0: i32) -> (i32, i32) {
    %c0_i32 = arith.constant 0 : i32
    %c0_i32_0 = arith.constant 0 : i32
    %c0_i32_1 = arith.constant 0 : i32
    return %c0_i32, %c0_i32_0 : i32, i32
  }
  func.func @transform_13(%arg0: i32) -> (i32, i32) {
    %c0_i32 = arith.constant 0 : i32
    %c0_i32_0 = arith.constant 0 : i32
    %c0_i32_1 = arith.constant 0 : i32
    return %c0_i32, %c0_i32_0 : i32, i32
  }
  func.func @transform_14(%arg0: i32) -> (i32, i32) {
    %c0_i32 = arith.constant 0 : i32
    %c0_i32_0 = arith.constant 0 : i32
    %c0_i32_1 = arith.constant 0 : i32
    return %c0_i32, %c0_i32_0 : i32, i32
  }
  func.func @transform_15(%arg0: i32) -> (i32, i32) {
    %c0_i32 = arith.constant 0 : i32
    %c0_i32_0 = arith.constant 0 : i32
    %c0_i32_1 = arith.constant 0 : i32
    return %c0_i32, %c0_i32_0 : i32, i32
  }
  func.func @transform_16(%arg0: i32) -> (i32, i32) {
    %c0_i32 = arith.constant 0 : i32
    %c0_i32_0 = arith.constant 0 : i32
    %c0_i32_1 = arith.constant 0 : i32
    return %c0_i32, %c0_i32_0 : i32, i32
  }
  func.func @transform_17(%arg0: i32) -> (i32, i32) {
    %c0_i32 = arith.constant 0 : i32
    %c0_i32_0 = arith.constant 0 : i32
    %c0_i32_1 = arith.constant 0 : i32
    return %c0_i32, %c0_i32_0 : i32, i32
  }
  func.func @transform_18(%arg0: i32) -> (i32, i32) {
    %c0_i32 = arith.constant 0 : i32
    %c0_i32_0 = arith.constant 0 : i32
    %c0_i32_1 = arith.constant 0 : i32
    return %c0_i32, %c0_i32_0 : i32, i32
  }
  func.func @transform_19(%arg0: i32) -> (i32, i32) {
    %c0_i32 = arith.constant 0 : i32
    %c0_i32_0 = arith.constant 0 : i32
    %c0_i32_1 = arith.constant 0 : i32
    return %c0_i32, %c0_i32_0 : i32, i32
  }
  func.func @transform_20(%arg0: i32) -> (i32, i32) {
    %c0_i32 = arith.constant 0 : i32
    %c0_i32_0 = arith.constant 0 : i32
    %c0_i32_1 = arith.constant 0 : i32
    return %c0_i32, %c0_i32_0 : i32, i32
  }
  func.func @transform_21(%arg0: i32) -> (i32, i32) {
    %c0_i32 = arith.constant 0 : i32
    %c0_i32_0 = arith.constant 0 : i32
    %c0_i32_1 = arith.constant 0 : i32
    return %c0_i32, %c0_i32_0 : i32, i32
  }
  func.func @transform_22(%arg0: i32) -> (i32, i32) {
    %c0_i32 = arith.constant 0 : i32
    %c0_i32_0 = arith.constant 0 : i32
    %c0_i32_1 = arith.constant 0 : i32
    return %c0_i32, %c0_i32_0 : i32, i32
  }
}

</mosaic_0001>

<bundles_post_ra>
// kernel: _lambda_.1
= control target key start
LH: loop header
LB: loop body
LE: loop exit
PB: predicated region body
PF: predicated region fallthrough
CT: control target
= control target key end

     0   :  { %s5532_s0 = inlined_call_operand.hbm [shape: f32[2,8,32], index: 0, kind: input, shape index: {}]   ;;  %s5533_s1 = inlined_call_operand.hbm [shape: f32[2,4,16], index: 1, kind: input, shape index: {}]   ;;  %s5534_s2 = inlined_call_operand.hbm [shape: f32[32,32], index: 2, kind: input, shape index: {}]   ;;  %s5535_s3 = inlined_call_operand.vmem [shape: f32[1,32], index: 3, kind: input, shape index: {}]   ;;  %s5536_s4 = inlined_call_operand.hbm [shape: f32[32,2], index: 4, kind: input, shape index: {}]   ;;  %s5537_s5 = inlined_call_operand.vmem [shape: f32[1,2], index: 5, kind: input, shape index: {}]   ;;  %s5538_s6 = inlined_call_operand.hbm [shape: f32[16,32], index: 6, kind: input, shape index: {}]   ;;  %s5539_s7 = inlined_call_operand.vmem [shape: f32[1,32], index: 7, kind: input, shape index: {}]   ;;  %s5540_s8 = inlined_call_operand.hbm [shape: f32[64,32], index: 8, kind: input, shape index: {}]   ;;  %s5541_s9 = inlined_call_operand.vmem [shape: f32[1,32], index: 9, kind: input, shape index: {}]   ;;  %s5542_s10 = inlined_call_operand.hbm [shape: f32[16,32], index: 10, kind: input, shape index: {}]   ;;  %s5543_s11 = inlined_call_operand.vmem [shape: f32[1,32], index: 11, kind: input, shape index: {}]   ;;  %s5544_s12 = inlined_call_operand.hbm [shape: f32[32,2], index: 12, kind: input, shape index: {}]   ;;  %s5545_s13 = inlined_call_operand.vmem [shape: f32[1,2], index: 13, kind: input, shape index: {}]   ;;  %s5546_s14 = inlined_call_operand.hbm [shape: f32[32,32], index: 14, kind: input, shape index: {}]   ;;  %s5547_s15 = inlined_call_operand.vmem [shape: f32[1,32], index: 15, kind: input, shape index: {}]   ;;  %s5548_s16 = inlined_call_operand.hbm [shape: f32[64,32], index: 16, kind: input, shape index: {}]   ;;  %s5549_s17 = inlined_call_operand.vmem [shape: f32[1,32], index: 17, kind: input, shape index: {}]   ;;  %s5550_s18 = inlined_call_operand.hbm [shape: f32[32,32], index: 18, kind: input, shape index: {}]   ;;  %s5551_s19 = inlined_call_operand.vmem [shape: f32[1,32], index: 19, kind: input, shape index: {}]   ;;  %s5552_s20 = inlined_call_operand.vmem [shape: f32[64,32], index: 20, kind: input, shape index: {}]   ;;  %s5553_s21 = inlined_call_operand.vmem [shape: f32[1,32], index: 21, kind: input, shape index: {}]   ;;  %s5554_s22 = inlined_call_operand.hbm [shape: f32[2,32], index: 22, kind: output, shape index: {}]  }
   0x1   :  { %5563 = sst [smem:[#allocation28_spill]] %s5532_s0 }
   0x2   :  { %5564 = sst [smem:[#allocation29_spill]] %s5533_s1 }
   0x3   :  { %5565 = sst [smem:[#allocation30_spill]] %s5534_s2 }
   0x4   :  { %5566 = sst [smem:[#allocation31_spill]] %s5535_s3 }
   0x5   :  { %5567 = sst [smem:[#allocation32_spill]] %s5536_s4 }
   0x6   :  { %5568 = sst [smem:[#allocation33_spill]] %s5537_s5 }
   0x7   :  { %5569 = sst [smem:[#allocation34_spill]] %s5538_s6 }
   0x8   :  { %5570 = sst [smem:[#allocation35_spill]] %s5551_s19 }
   0x9   :  { %5571 = sst [smem:[#allocation36_spill]] %s5553_s21 }
   0xa   :  { %5572 = sst [smem:[#allocation37_spill]] %s5554_s22 }
   0xb   :  { %27 = vsyncpa [#allocation3], 0 }
   0xc   :  { %28 = vsyncpa [#allocation6], 0 }
   0xd   :  { %29 = vsyncpa [#allocation9], 0 }
   0xe   :  { %30 = vsyncpa [#allocation12], 0 }
   0xf   :  { %31 = vsyncpa [#allocation15], 0 }
  0x10   :  { %32 = vsyncpa [#allocation18], 0 }
  0x11   :  { %33 = vsyncpa [#allocation4], 0  ;;  %s4711_s3 = smov [#allocation5]   ;;  %s5573_s4 = sld [smem:[#allocation29_spill]] }
  0x12   :  { %s51_s28 = sshll.u32 %s4711_s3, 4  ;;  %s52_s28 = int_to_ptr.vmem [resolvable:$true] %s51_s28 }
  0x17   :  { %s4433_s0 = scalar_lea.hbm %s5573_s4, 128 }
  0x18   :  { %p4434_p0 = scmp.ne.s32.totalorder %s5573_s4, %s4433_s0  ;;  %p4437_p1 = scmp.lt.u32.totalorder %s4433_s0, %s5573_s4 }
  0x1a   :  { %p4439_p2 = pnand %p4437_p1, %p4434_p0 }
  0x1c   :  { %4442 = shalt.err (!%p4439_p2)
}
  0x1d   :  { %s4443_s6 = scalar_lea.vmem %s52_s28, 128  ;;  %p4448_p4 = scmp.lt.s32.totalorder %s52_s28, %s52_s28 }
  0x1e   :  { %p4444_p3 = scmp.ne.s32.totalorder %s52_s28, %s4443_s6  ;;  %p4449_p5 = scmp.lt.s32.totalorder %s4443_s6, %s4443_s6 }
  0x20   :  { %p4450_p6 = por %p4449_p5, %p4448_p4 }
  0x22   :  { %p4451_p7 = pnand %p4450_p6, %p4444_p3 }
  0x24   :  { %4454 = shalt.err (!%p4451_p7)
}
  0x25   :  { %s4712_s25 = smov 64   ;;  %s4713_s26 = smov 4  }
  0x26   :  { %57 = dma.hbm_to_vmem [thread:$0]  %s5573_s4, 128, %s52_s28, [#allocation6], %s4712_s25, %s4712_s25, %s4713_s26  }
  0x27   :  { %s4714_s3 = smov [#allocation8]   ;;  %s4715_s30 = smov [#allocation11]  }
  0x28   :  { %s77_s29 = sshll.u32 %s4714_s3, 4  ;;  %s105_s0 = sshll.u32 %s4715_s30, 4  ;;  %s78_s29 = int_to_ptr.vmem [resolvable:$true] %s77_s29  ;;  %s106_s0 = int_to_ptr.vmem [resolvable:$true] %s105_s0 }
  0x29   :  { %s5574_s5 = sld [smem:[#allocation32_spill]] }
  0x2f   :  { %s4455_s24 = scalar_lea.hbm %s5574_s5, 512 }
  0x30   :  { %p4456_p8 = scmp.ne.s32.totalorder %s5574_s5, %s4455_s24  ;;  %p4459_p9 = scmp.lt.u32.totalorder %s4455_s24, %s5574_s5 }
  0x32   :  { %p4461_p10 = pnand %p4459_p9, %p4456_p8 }
  0x34   :  { %4464 = shalt.err (!%p4461_p10)
}
  0x35   :  { %s4465_s28 = scalar_lea.vmem %s78_s29, 512  ;;  %p4470_p12 = scmp.lt.s32.totalorder %s78_s29, %s78_s29 }
  0x36   :  { %p4466_p11 = scmp.ne.s32.totalorder %s78_s29, %s4465_s28  ;;  %p4471_p13 = scmp.lt.s32.totalorder %s4465_s28, %s4465_s28 }
  0x38   :  { %p4472_p0 = por %p4471_p13, %p4470_p12 }
  0x3a   :  { %p4473_p1 = pnand %p4472_p0, %p4466_p11 }
  0x3c   :  { %4476 = shalt.err (!%p4473_p1)
}
  0x3d   :  { %s4716_s4 = smov 128   ;;  %s4717_s25 = smov 8  }
  0x3e   :  { %83 = dma.hbm_to_vmem [thread:$0]  %s5574_s5, 512, %s78_s29, [#allocation9], %s4716_s4, %s4716_s4, %s4717_s25  }
  0x3f   :  { %s4477_s2 = scalar_lea.hbm %s5540_s8, 1024 }
  0x40   :  { %p4478_p2 = scmp.ne.s32.totalorder %s5540_s8, %s4477_s2  ;;  %p4481_p3 = scmp.lt.u32.totalorder %s4477_s2, %s5540_s8 }
  0x42   :  { %p4483_p4 = pnand %p4481_p3, %p4478_p2 }
  0x44   :  { %4486 = shalt.err (!%p4483_p4)
}
  0x45   :  { %s4487_s1 = scalar_lea.vmem %s106_s0, 1024  ;;  %p4492_p6 = scmp.lt.s32.totalorder %s106_s0, %s106_s0 }
  0x46   :  { %p4488_p5 = scmp.ne.s32.totalorder %s106_s0, %s4487_s1  ;;  %p4493_p7 = scmp.lt.s32.totalorder %s4487_s1, %s4487_s1 }
  0x48   :  { %p4494_p8 = por %p4493_p7, %p4492_p6 }
  0x4a   :  { %p4495_p9 = pnand %p4494_p8, %p4488_p5 }
  0x4c   :  { %4498 = shalt.err (!%p4495_p9)
}
  0x4d   :  { %111 = dma.hbm_to_vmem [thread:$0]  %s5540_s8, 1024, %s106_s0, [#allocation12], %s4716_s4, %s4716_s4, %s4717_s25  }
  0x4e   :  { %s4718_s24 = smov [#allocation14]   ;;  %s4719_s28 = smov [#allocation17]  }
  0x4f   :  { %s133_s6 = sshll.u32 %s4718_s24, 4  ;;  %s161_s22 = sshll.u32 %s4719_s28, 4  ;;  %s134_s6 = int_to_ptr.vmem [resolvable:$true] %s133_s6  ;;  %s162_s22 = int_to_ptr.vmem [resolvable:$true] %s161_s22 }
  0x50   :  { %s4499_s21 = scalar_lea.hbm %s5544_s12, 512 }
  0x51   :  { %p4500_p10 = scmp.ne.s32.totalorder %s5544_s12, %s4499_s21  ;;  %p4503_p11 = scmp.lt.u32.totalorder %s4499_s21, %s5544_s12 }
  0x53   :  { %p4505_p12 = pnand %p4503_p11, %p4500_p10 }
  0x55   :  { %4508 = shalt.err (!%p4505_p12)
}
  0x56   :  { %s4509_s8 = scalar_lea.vmem %s134_s6, 512  ;;  %p4514_p0 = scmp.lt.s32.totalorder %s134_s6, %s134_s6 }
  0x57   :  { %p4510_p13 = scmp.ne.s32.totalorder %s134_s6, %s4509_s8  ;;  %p4515_p1 = scmp.lt.s32.totalorder %s4509_s8, %s4509_s8 }
  0x59   :  { %p4516_p2 = por %p4515_p1, %p4514_p0 }
  0x5b   :  { %p4517_p3 = pnand %p4516_p2, %p4510_p13 }
  0x5d   :  { %4520 = shalt.err (!%p4517_p3)
}
  0x5e   :  { %139 = dma.hbm_to_vmem [thread:$0]  %s5544_s12, 512, %s134_s6, [#allocation15], %s4716_s4, %s4716_s4, %s4717_s25  }
  0x5f   :  { %s4521_s5 = scalar_lea.hbm %s5548_s16, 1024 }
  0x60   :  { %p4522_p4 = scmp.ne.s32.totalorder %s5548_s16, %s4521_s5  ;;  %p4525_p5 = scmp.lt.u32.totalorder %s4521_s5, %s5548_s16 }
  0x62   :  { %p4527_p6 = pnand %p4525_p5, %p4522_p4 }
  0x64   :  { %4530 = shalt.err (!%p4527_p6)
}
  0x65   :  { %s4531_s21 = scalar_lea.vmem %s162_s22, 1024  ;;  %p4536_p8 = scmp.lt.s32.totalorder %s162_s22, %s162_s22 }
  0x66   :  { %p4532_p7 = scmp.ne.s32.totalorder %s162_s22, %s4531_s21  ;;  %p4537_p9 = scmp.lt.s32.totalorder %s4531_s21, %s4531_s21 }
  0x68   :  { %p4538_p10 = por %p4537_p9, %p4536_p8 }
  0x6a   :  { %p4539_p11 = pnand %p4538_p10, %p4532_p7 }
  0x6c   :  { %4542 = shalt.err (!%p4539_p11)
}
  0x6d   :  { %167 = dma.hbm_to_vmem [thread:$0]  %s5548_s16, 1024, %s162_s22, [#allocation18], %s4716_s4, %s4716_s4, %s4717_s25  }
  0x6e   :  { %s4720_s2 = smov [#allocation2]   ;;  %s4721_s3 = smov [#allocation7]  }
  0x6f   :  { %s39_s27 = sshll.u32 %s4720_s2, 4  ;;  %s63_s30 = sshll.u32 %s4721_s3, 4  ;;  %s40_s27 = int_to_ptr.vmem [resolvable:$true] %s39_s27  ;;  %s64_s30 = int_to_ptr.vmem [resolvable:$true] %s63_s30 }
  0x70   :  { %s5575_s23 = sld [smem:[#allocation28_spill]] }
  0x76   :  { %s4543_s1 = scalar_lea.hbm %s5575_s23, 256 }
  0x77   :  { %p4544_p12 = scmp.ne.s32.totalorder %s5575_s23, %s4543_s1  ;;  %p4547_p13 = scmp.lt.u32.totalorder %s4543_s1, %s5575_s23 }
  0x79   :  { %p4549_p0 = pnand %p4547_p13, %p4544_p12 }
  0x7b   :  { %4552 = shalt.err (!%p4549_p0)
}
  0x7c   :  { %s4553_s16 = scalar_lea.vmem %s40_s27, 256  ;;  %p4558_p2 = scmp.lt.s32.totalorder %s40_s27, %s40_s27 }
  0x7d   :  { %p4554_p1 = scmp.ne.s32.totalorder %s40_s27, %s4553_s16  ;;  %p4559_p3 = scmp.lt.s32.totalorder %s4553_s16, %s4553_s16 }
  0x7f   :  { %p4560_p4 = por %p4559_p3, %p4558_p2 }
  0x81   :  { %p4561_p5 = pnand %p4560_p4, %p4554_p1 }
  0x83   :  { %4564 = shalt.err (!%p4561_p5)
}
  0x84   :  { %45 = dma.hbm_to_vmem [thread:$0]  %s5575_s23, 256, %s40_s27, [#allocation3], %s4716_s4, %s4716_s4, %s4717_s25  }
  0x85   :  { %s5576_s12 = sld [smem:[#allocation30_spill]] }
  0x8b   :  { %s4565_s6 = scalar_lea.hbm %s5576_s12, 512 }
  0x8c   :  { %p4566_p6 = scmp.ne.s32.totalorder %s5576_s12, %s4565_s6  ;;  %p4569_p7 = scmp.lt.u32.totalorder %s4565_s6, %s5576_s12 }
  0x8e   :  { %p4571_p8 = pnand %p4569_p7, %p4566_p6 }
  0x90   :  { %4574 = shalt.err (!%p4571_p8)
}
  0x91   :  { %s4575_s1 = scalar_lea.vmem %s64_s30, 512  ;;  %p4580_p10 = scmp.lt.s32.totalorder %s64_s30, %s64_s30 }
  0x92   :  { %p4576_p9 = scmp.ne.s32.totalorder %s64_s30, %s4575_s1  ;;  %p4581_p11 = scmp.lt.s32.totalorder %s4575_s1, %s4575_s1 }
  0x94   :  { %p4582_p12 = por %p4581_p11, %p4580_p10 }
  0x96   :  { %p4583_p13 = pnand %p4582_p12, %p4576_p9 }
  0x98   :  { %4586 = shalt.err (!%p4583_p13)
}
  0x99   :  { %69 = dma.hbm_to_vmem [thread:$0]  %s5576_s12, 512, %s64_s30, [#allocation6], %s4716_s4, %s4716_s4, %s4717_s25  }
  0x9a   :  { %s4722_s29 = smov [#allocation10]   ;;  %s4723_s24 = smov [#allocation13]  }
  0x9b   :  { %s91_s5 = sshll.u32 %s4722_s29, 4  ;;  %s119_s28 = sshll.u32 %s4723_s24, 4  ;;  %s92_s5 = int_to_ptr.vmem [resolvable:$true] %s91_s5  ;;  %s120_s28 = int_to_ptr.vmem [resolvable:$true] %s119_s28 }
  0x9c   :  { %s5577_s26 = sld [smem:[#allocation34_spill]] }
  0xa2   :  { %s4587_s19 = scalar_lea.hbm %s5577_s26, 256 }
  0xa3   :  { %p4588_p0 = scmp.ne.s32.totalorder %s5577_s26, %s4587_s19  ;;  %p4591_p1 = scmp.lt.u32.totalorder %s4587_s19, %s5577_s26 }
  0xa5   :  { %p4593_p2 = pnand %p4591_p1, %p4588_p0 }
  0xa7   :  { %4596 = shalt.err (!%p4593_p2)
}
  0xa8   :  { %s4597_s30 = scalar_lea.vmem %s92_s5, 256  ;;  %p4602_p4 = scmp.lt.s32.totalorder %s92_s5, %s92_s5 }
  0xa9   :  { %p4598_p3 = scmp.ne.s32.totalorder %s92_s5, %s4597_s30  ;;  %p4603_p5 = scmp.lt.s32.totalorder %s4597_s30, %s4597_s30 }
  0xab   :  { %p4604_p6 = por %p4603_p5, %p4602_p4 }
  0xad   :  { %p4605_p7 = pnand %p4604_p6, %p4598_p3 }
  0xaf   :  { %4608 = shalt.err (!%p4605_p7)
}
  0xb0   :  { %97 = dma.hbm_to_vmem [thread:$0]  %s5577_s26, 256, %s92_s5, [#allocation9], %s4716_s4, %s4716_s4, %s4717_s25  }
  0xb1   :  { %s4609_s27 = scalar_lea.hbm %s5542_s10, 256 }
  0xb2   :  { %p4610_p8 = scmp.ne.s32.totalorder %s5542_s10, %s4609_s27  ;;  %p4613_p9 = scmp.lt.u32.totalorder %s4609_s27, %s5542_s10 }
  0xb4   :  { %p4615_p10 = pnand %p4613_p9, %p4610_p8 }
  0xb6   :  { %4618 = shalt.err (!%p4615_p10)
}
  0xb7   :  { %s4619_s22 = scalar_lea.vmem %s120_s28, 256  ;;  %p4624_p12 = scmp.lt.s32.totalorder %s120_s28, %s120_s28 }
  0xb8   :  { %p4620_p11 = scmp.ne.s32.totalorder %s120_s28, %s4619_s22  ;;  %p4625_p13 = scmp.lt.s32.totalorder %s4619_s22, %s4619_s22 }
  0xba   :  { %p4626_p0 = por %p4625_p13, %p4624_p12 }
  0xbc   :  { %p4627_p1 = pnand %p4626_p0, %p4620_p11 }
  0xbe   :  { %4630 = shalt.err (!%p4627_p1)
}
  0xbf   :  { %125 = dma.hbm_to_vmem [thread:$0]  %s5542_s10, 256, %s120_s28, [#allocation12], %s4716_s4, %s4716_s4, %s4717_s25  }
  0xc0   :  { %s4724_s19 = smov [#allocation16]   ;;  %s4725_s6 = smov [#allocation19]  }
  0xc1   :  { %s147_s21 = sshll.u32 %s4724_s19, 4  ;;  %s175_s2 = sshll.u32 %s4725_s6, 4  ;;  %s148_s21 = int_to_ptr.vmem [resolvable:$true] %s147_s21  ;;  %s176_s2 = int_to_ptr.vmem [resolvable:$true] %s175_s2 }
  0xc2   :  { %s4631_s12 = scalar_lea.hbm %s5546_s14, 512 }
  0xc3   :  { %p4632_p2 = scmp.ne.s32.totalorder %s5546_s14, %s4631_s12  ;;  %p4635_p3 = scmp.lt.u32.totalorder %s4631_s12, %s5546_s14 }
  0xc5   :  { %p4637_p4 = pnand %p4635_p3, %p4632_p2 }
  0xc7   :  { %4640 = shalt.err (!%p4637_p4)
}
  0xc8   :  { %s4641_s10 = scalar_lea.vmem %s148_s21, 512  ;;  %p4646_p6 = scmp.lt.s32.totalorder %s148_s21, %s148_s21 }
  0xc9   :  { %p4642_p5 = scmp.ne.s32.totalorder %s148_s21, %s4641_s10  ;;  %p4647_p7 = scmp.lt.s32.totalorder %s4641_s10, %s4641_s10 }
  0xcb   :  { %p4648_p8 = por %p4647_p7, %p4646_p6 }
  0xcd   :  { %p4649_p9 = pnand %p4648_p8, %p4642_p5 }
  0xcf   :  { %4652 = shalt.err (!%p4649_p9)
}
  0xd0   :  { %153 = dma.hbm_to_vmem [thread:$0]  %s5546_s14, 512, %s148_s21, [#allocation15], %s4716_s4, %s4716_s4, %s4717_s25  }
  0xd1   :  { %s4653_s16 = scalar_lea.hbm %s5550_s18, 512 }
  0xd2   :  { %p4654_p10 = scmp.ne.s32.totalorder %s5550_s18, %s4653_s16  ;;  %p4657_p11 = scmp.lt.u32.totalorder %s4653_s16, %s5550_s18 }
  0xd4   :  { %p4659_p12 = pnand %p4657_p11, %p4654_p10 }
  0xd6   :  { %4662 = shalt.err (!%p4659_p12)
}
  0xd7   :  { %s4663_s6 = scalar_lea.vmem %s176_s2, 512  ;;  %p4668_p0 = scmp.lt.s32.totalorder %s176_s2, %s176_s2 }
  0xd8   :  { %p4664_p13 = scmp.ne.s32.totalorder %s176_s2, %s4663_s6  ;;  %p4669_p1 = scmp.lt.s32.totalorder %s4663_s6, %s4663_s6 }
  0xda   :  { %p4670_p2 = por %p4669_p1, %p4668_p0 }
  0xdc   :  { %p4671_p3 = pnand %p4670_p2, %p4664_p13 }
  0xde   :  { %4674 = shalt.err (!%p4671_p3)
}
  0xdf   :  { %181 = dma.hbm_to_vmem [thread:$0]  %s5550_s18, 512, %s176_s2, [#allocation18], %s4716_s4, %s4716_s4, %s4717_s25  }
  0xe0   :  { %4697 = dma.done.wait [#allocation3], 256  }
  0xe1   :  { %4698 = vsyncadd [#allocation3], 4294967040 }
  0xe2   :  { %4699 = dma.done.wait [#allocation6], 640  }
  0xe3   :  { %4700 = vsyncadd [#allocation6], 4294966656 }
  0xe4   :  { %4701 = dma.done.wait [#allocation9], 768  }
  0xe5   :  { %4702 = vsyncadd [#allocation9], 4294966528 }
  0xe6   :  { %4703 = dma.done.wait [#allocation12], 1280  }
  0xe7   :  { %4704 = vsyncadd [#allocation12], 4294966016 }
  0xe8   :  { %4705 = dma.done.wait [#allocation15], 1024  }
  0xe9   :  { %4706 = vsyncadd [#allocation15], 4294966272 }
  0xea   :  { %4707 = dma.done.wait [#allocation18], 1536  }
  0xeb   :  { %4708 = vsyncadd [#allocation18], 4294965760  ;;  %v4726_v0 = vmov 0.0|0.0   ;;  %vm4727_vm0 = vmmov 0   ;;  %v4728_v1 = vmov 0.0   ;;  %v248_v2 = vld [vmem:[#allocation7] sm:$0xff] }
  0xec   :  { %4105 = vmatprep.subr.bf16.mxu0 %v4726_v0  ;;  %3765 = vmatprep.mubr.msk.f32.mxu0 %vm4727_vm0, %v4728_v1  ;;  %v249_v3 = vld [vmem:[#allocation7 + $0x8] sm:$0xff]  ;;  %v250_v4 = vld [vmem:[#allocation7 + $0x10] sm:$0xff]  ;;  %v251_v6 = vld [vmem:[#allocation7 + $0x18] sm:$0xff]  ;;  %vm259_vm1 = vcmask 261120   ;;  %s5578_s25 = sld [smem:[#allocation31_spill]]  ;;  %v4729_v20 = vmov 0  }
  0xed   :  { %4111 = vmatprep.subr.bf16.mxu1 %v4726_v0  ;;  %3776 = vmatprep.mubr.msk.f32.mxu1 %vm4727_vm0, %v4728_v1  ;;  %v5018_v5 = vpack.c.bf16 %v249_v3, %v248_v2  ;;  %v334_v7 = vld [vmem:[#allocation8] sm:$0xff]  ;;  %v335_v8 = vld [vmem:[#allocation8 + $0x8] sm:$0xff]  ;;  %v5021_v9 = vpack.c.bf16 %v251_v6, %v250_v4  ;;  %v336_v12 = vld [vmem:[#allocation8 + $0x10] sm:$0xff]  ;;  %s5579_s30 = sld [smem:[#allocation33_spill]]  ;;  %vm418_vm2 = vcmask 15360   ;;  %v4730_v47 = vmov 1  }
  0xee   :  { %v5023_v10 = vpack.c.bf16 %v335_v8, %v334_v7  ;;  %v5029_v11 = vld [vmem:[#allocation2] sm:$0xff]  ;;  %v337_v13 = vld [vmem:[#allocation8 + $0x18] sm:$0xff]  ;;  %4363 = vset.pattern.permute.xlu0 %v4729_v20  ;;  %4365 = vset.pattern.permute.xlu1 %v4729_v20  ;;  %v463_v44 = vld [vmem:[#allocation10] sm:$0xff]  ;;  %vm472_vm3 = vcmask 130048   ;;  %s4732_s10 = smov 1e-12  }
  0xef   :  { %4107 = vmatpush3.bf16.msra.mxu0 %v5018_v5  ;;  %v5036_v14 = vpack.c.bf16 %v337_v13, %v336_v12  ;;  %v464_v45 = vld [vmem:[#allocation10 + $0x8] sm:$0xff]  ;;  %v547_v48 = vld [vmem:[#allocation11] sm:$0xff]  ;;  %v548_v49 = vld [vmem:[#allocation11 + $0x8] sm:$0xff] }
  0xf0   :  { %4108 = vmatprep.subr.bf16.mxu0 %v4726_v0  ;;  %4113 = vmatpush3.bf16.msra.mxu1 %v5023_v10  ;;  %v5059_v46 = vpack.c.bf16 %v464_v45, %v463_v44  ;;  %v5064_v50 = vld [vmem:[#allocation5] sm:$0xf]  ;;  %v5066_v51 = vpack.c.bf16 %v548_v49, %v547_v48  ;;  %v549_v52 = vld [vmem:[#allocation11 + $0x10] sm:$0xff]  ;;  %v550_v53 = vld [vmem:[#allocation11 + $0x18] sm:$0xff] }
  0xf1   :  { %4114 = vmatprep.subr.bf16.mxu1 %v4726_v0  ;;  %v5074_v54 = vpack.c.bf16 %v550_v53, %v549_v52  ;;  %v625_v4 = vld [vmem:[#allocation11 + $0x20] sm:$0xff]  ;;  %v626_v6 = vld [vmem:[#allocation11 + $0x28] sm:$0xff] }
  0xf2   :  { %v5043_v15 = vld [vmem:[%s5578_s25] ss:$0 sm:$0xff]  ;;  %v5082_v13 = vpack.c.bf16 %v626_v6, %v625_v4 }
  0xf3   :  { %4110 = vmatpush3.bf16.msra.mxu0 %v5021_v9  ;;  %v5054_v21 = vld [vmem:[%s5579_s30] ss:$0 sm:$0xff] }
  0xf4   :  { %4132 = vmatprep.subr.bf16.mxu0 %v4726_v0  ;;  %4116 = vmatpush3.bf16.msra.mxu1 %v5036_v14 }
  0xf5   :  { %4117 = vmatprep.subr.bf16.mxu1 %v4726_v0 }
  0xf6   :  { %3766 = vmatmul.mubr.msk.f32.vlgmr.msra.gmra.mrb[0].mxu0 %vm259_vm1, %v5029_v11 }
  0xf7   :  { %3816 = vmatprep.mubr.msk.f32.mxu0 %vm4727_vm0, %v4728_v1 }
 0x1c9   :  { %v329_v16 = vpop.f32.mrb[0].mxu0 }
 0x1ca   :  { %v330_v17 = vadd.f32 %v5043_v15, %v329_v16  ;;  %v3767_v18 = vpop.f32.mrb[1].mxu0 }
 0x1cb   :  { %v628_v18 = vld [vmem:[#allocation11 + $0x38] sm:$0xff] }
 0x1cc   :  { %v333_v19 = vmax.f32 %v330_v17, 0.0  ;;  %v627_v17 = vld [vmem:[#allocation11 + $0x30] sm:$0xff] }
 0x1ce   :  { %3777 = vmatmul.mubr.msk.f32.vlgmr.msra.gmra.mrb[0].mxu1 %vm259_vm1, %v333_v19 }
 0x1cf   :  { %3783 = vmatprep.mubr.msk.f32.mxu1 %vm4727_vm0, %v4728_v1  ;;  %4119 = vmatpush3.bf16.msra.mxu1 %v5059_v46 }
 0x1d0   :  { %4120 = vmatprep.subr.bf16.mxu1 %v4726_v0 }
 0x1d2   :  { %3784 = vmatmul.mubr.msk.f32.vlgmr.msra.gmra.mrb[2].mxu1 %vm472_vm3, %v5064_v50 }
 0x1d3   :  { %4122 = vmatpush3.bf16.msra.mxu1 %v5066_v51  ;;  %3794 = vmatprep.mubr.msk.f32.mxu1 %vm4727_vm0, %v4728_v1 }
 0x1d4   :  { %4123 = vmatprep.subr.bf16.mxu1 %v4726_v0 }
 0x1d7   :  { %4125 = vmatpush3.bf16.msra.mxu1 %v5074_v54 }
 0x1d8   :  { %4126 = vmatprep.subr.bf16.mxu1 %v4726_v0 }
 0x2a1   :  { %v414_v22 = vpop.f32.mrb[0].mxu1 }
 0x2a2   :  { %v415_v23 = vadd.f32 %v5054_v21, %v414_v22  ;;  %v3778_v24 = vpop.f32.mrb[1].mxu1 }
 0x2a4   :  { %v419_v25 = vsel %vm418_vm2, %v415_v23, -inf }
 0x2a5   :  { %v420_v26 = vrot.slane %v419_v25, 4  ;;  %v542_v24 = vpop.f32.mrb[2].mxu1 }
 0x2a7   :  { %v421_v27 = vmax.f32 %v419_v25, %v420_v26  ;;  %v3785_v25 = vpop.f32.mrb[3].mxu1  ;;  %v221_v26 = vlaneseq }
 0x2a9   :  { %v422_v28 = vrot.slane %v421_v27, 2 }
 0x2ab   :  { %v423_v29 = vmax.f32 %v421_v27, %v422_v28  ;;  %v5102_v27 = vshrl.u32 %v221_v26, 7  ;;  %v227_v28 = vand.u32 127, %v221_v26 }
 0x2ad   :  { %v424_v30 = vrot.slane %v423_v29, 1 }
 0x2af   :  { %v425_v31 = vmax.f32 %v423_v29, %v424_v30  ;;  %v228_v29 = vmul.u32 2, %v227_v28  ;;  %v223_v30 = vadd.s32 8, %v5102_v27 }
 0x2b1   :  { %v426_v32 = vsub.f32 %v415_v23, %v425_v31  ;;  %v233_v31 = vadd.s32 1, %v228_v29  ;;  %vm229_vm4 = vcmp.eq.s32.totalorder %v5102_v27, %v228_v29  ;;  %vm230_vm5 = vcmp.eq.s32.totalorder %v223_v30, %v228_v29 }
 0x2b3   :  { %v427_v33 = vmul.f32 1.442695, %v426_v32  ;;  %vm234_vm6 = vcmp.eq.s32.totalorder %v5102_v27, %v233_v31  ;;  %vm235_vm7 = vcmp.eq.s32.totalorder %v223_v30, %v233_v31  ;;  %v224_v32 = vadd.s32 16, %v5102_v27 }
 0x2b4   :  { %vm238_vm8 = vmor %vm229_vm4, %vm234_vm6 }
 0x2b5   :  { %4369 = vpow2.f32 %v427_v33  ;;  %vm239_vm9 = vmor %vm230_vm5, %vm235_vm7  ;;  %v225_v33 = vadd.s32 24, %v5102_v27  ;;  %vm231_vm11 = vcmp.eq.s32.totalorder %v224_v32, %v228_v29  ;;  %vm236_vm13 = vcmp.eq.s32.totalorder %v224_v32, %v233_v31 }
 0x2b6   :  { %vm5109_vm10 = vmpackc.low %vm239_vm9, %vm238_vm8 }
 0x2b7   :  { %vm232_vm12 = vcmp.eq.s32.totalorder %v225_v33, %v228_v29  ;;  %vm237_vm14 = vcmp.eq.s32.totalorder %v225_v33, %v233_v31  ;;  %vm240_vm15 = vmor %vm231_vm11, %vm236_vm13  ;;  %vm802_vm11 = vcmask 125952  }
 0x2b8   :  { %vm241_vm4 = vmor %vm232_vm12, %vm237_vm14  ;;  %vm993_vm14 = vcmask 11264  }
 0x2b9   :  { %vm5117_vm5 = vmpackc.low %vm241_vm4, %vm240_vm15 }
 0x2bf   :  { %v4370_v34 = vpop.eup %4369 }
 0x2c0   :  { %v429_v35 = vsel %vm418_vm2, %v4370_v34, 0.0 }
 0x2c1   :  { %v430_v36 = vrot.slane %v429_v35, 4 }
 0x2c3   :  { %v431_v37 = vadd.f32 %v430_v36, %v429_v35  ;;  %v4731_v35 = vmov 1.0|1.0  }
 0x2c4   :  { %4134 = vmatpush3.bf16.msk.msra.mxu0 %vm5109_vm10, %v4731_v35 }
 0x2c5   :  { %v432_v38 = vrot.slane %v431_v37, 2  ;;  %4135 = vmatprep.subr.bf16.mxu0 %v4726_v0 }
 0x2c7   :  { %v433_v39 = vadd.f32 %v432_v38, %v431_v37  ;;  %v546_v37 = vld [vmem:[%s5541_s9] sm:$0x1]  ;;  %v706_v38 = vsub.s32 0, %v5102_v27 }
 0x2c8   :  { %4137 = vmatpush3.bf16.msk.msra.mxu0 %vm5117_vm5, %v4731_v35 }
 0x2c9   :  { %v434_v40 = vrot.slane %v433_v39, 1  ;;  %4138 = vmatprep.subr.bf16.mxu0 %v4726_v0 }
 0x2cb   :  { %v435_v41 = vadd.f32 %v434_v40, %v433_v39  ;;  %v5132_v39 = vld [vmem:[%s5539_s7] ss:$0 sm:$0xff] }
 0x2cd   :  { %4371 = vrcp.f32 %v435_v41 }
 0x2d7   :  { %v4372_v42 = vpop.eup %4371 }
 0x2d8   :  { %v437_v43 = vmul.f32 %v4372_v42, %v4370_v34 }
 0x2da   :  { %440 = vperm.xlu0 %4363, %v437_v43  }
 0x2de   :  { %4364 = vset.pattern.permute.xlu0 %v4730_v47 }
 0x2df   :  { %452 = vperm.xlu0 %4364, %v437_v43   ;;  %v543_v43 = vadd.f32 %v5132_v39, %v542_v24 }
 0x359   :  { %v441_v55 = vpop.permute.xlu0 %440 }
 0x35a   :  { %v443_v56 = vmul.f32 %v441_v55, %v5029_v11 }
 0x35c   :  { %v444_v57 = vsel %vm259_vm1, %v443_v56, 0.0 }
 0x35d   :  { %v445_v58 = vrot.slane %v444_v57, 4 }
 0x35e   :  { %v453_v59 = vpop.permute.xlu0 %452 }
 0x35f   :  { %v446_v60 = vadd.f32 %v445_v58, %v444_v57  ;;  %v455_v61 = vmul.f32 %v453_v59, %v5029_v11  ;;  %v5089_v11 = vpack.c.bf16 %v628_v18, %v627_v17  ;;  %v826_v18 = vld [vmem:[#allocation13] sm:$0xff] }
 0x361   :  { %v447_v62 = vrot.slane %v446_v60, 2  ;;  %v456_v63 = vsel %vm259_vm1, %v455_v61, 0.0 }
 0x362   :  { %v457_v2 = vrot.slane %v456_v63, 4 }
 0x363   :  { %v448_v3 = vadd.f32 %v447_v62, %v446_v60 }
 0x364   :  { %v458_v7 = vadd.f32 %v457_v2, %v456_v63 }
 0x365   :  { %v449_v8 = vrot.slane %v448_v3, 1 }
 0x366   :  { %v459_v12 = vrot.slane %v458_v7, 2 }
 0x367   :  { %v5084_v16 = vadd.f32 %v449_v8, %v448_v3 }
 0x368   :  { %v460_v19 = vadd.f32 %v459_v12, %v458_v7 }
 0x369   :  { %3795 = vmatmul.mubr.msk.f32.vlgmr.msra.gmra.mrb[4].mxu1 %vm259_vm1, %v5084_v16 }
 0x36a   :  { %4128 = vmatpush3.bf16.msra.mxu1 %v5082_v13  ;;  %3805 = vmatprep.mubr.msk.f32.mxu1 %vm4727_vm0, %v4728_v1  ;;  %v461_v22 = vrot.slane %v460_v19, 1 }
 0x36b   :  { %4129 = vmatprep.subr.bf16.mxu1 %v4726_v0 }
 0x36c   :  { %v5095_v23 = vadd.f32 %v461_v22, %v460_v19  ;;  %v827_v19 = vld [vmem:[#allocation13 + $0x8] sm:$0xff] }
 0x36d   :  { %v5141_v22 = vpack.c.bf16 %v827_v19, %v826_v18  ;;  %v1608_v18 = vld [vmem:[%s5552_s20 + $0x8] sm:$0xff] }
 0x36e   :  { %4131 = vmatpush3.bf16.msra.mxu1 %v5089_v11 }
 0x36f   :  { %4147 = vmatprep.subr.bf16.mxu1 %v4726_v0 }
 0x371   :  { %3806 = vmatmul.mubr.msk.f32.vlgmr.msra.gmra.mrb[4].mxu1 %vm259_vm1, %v5095_v23 }
 0x372   :  { %3841 = vmatprep.mubr.msk.f32.mxu1 %vm4727_vm0, %v4728_v1 }
 0x444   :  { %v698_v40 = vpop.f32.mrb[4].mxu1 }
 0x445   :  { %v4285_v41 = vadd.f32 %v698_v40, %v546_v37  ;;  %v3807_v42 = vpop.f32.mrb[5].mxu1 }
 0x446   :  { %v910_v42 = vld [vmem:[#allocation14 + $0x8] sm:$0xff] }
 0x447   :  { %v707_v44 = vrot.slane %v4285_v41, %v706_v38  ;;  %v909_v41 = vld [vmem:[#allocation14] sm:$0xff] }
 0x449   :  { %v709_v45 = vmul.f32 %v707_v44, %v543_v43  ;;  %v5146_v44 = vpack.c.bf16 %v910_v42, %v909_v41 }
 0x44b   :  { %3817 = vmatmul.mubr.msk.f32.vlgmr.msra.gmra.mrb[2].mxu0 %vm259_vm1, %v709_v45 }
 0x44c   :  { %3823 = vmatprep.mubr.msk.f32.mxu0 %vm4727_vm0, %v4728_v1  ;;  %4140 = vmatpush3.bf16.msra.mxu0 %v5141_v22 }
 0x44d   :  { %4141 = vmatprep.subr.bf16.mxu0 %v4726_v0 }
 0x51e   :  { %v779_v48 = vpop.f32.mrb[2].mxu0 }
 0x51f   :  { %v783_v49 = vmax.f32 %v779_v48, 0.0  ;;  %v791_v52 = vsub.f32 0.0, %v779_v48  ;;  %v3818_v53 = vpop.f32.mrb[3].mxu0  ;;  %v911_v48 = vld [vmem:[#allocation14 + $0x10] sm:$0xff] }
 0x520   :  { %v5160_v53 = vld [vmem:[%s5543_s11] ss:$0 sm:$0xff]  ;;  %s5585_s11 = sld [smem:[#allocation35_spill]] }
 0x521   :  { %4373 = vrsqrt.f32 %v783_v49  ;;  %v792_v55 = vmax.f32 %v791_v52, 0.0  ;;  %vm786_vm6 = vcmp.eq.f32.partialorder %v783_v49, inf  ;;  %v789_v61 = vand.u32 2147483648, %v783_v49 }
 0x522   :  { %vm788_vm8 = vcmp.eq.f32.partialorder %v783_v49, 0.0 }
 0x523   :  { %4375 = vrsqrt.f32 %v792_v55  ;;  %vm795_vm7 = vcmp.eq.f32.partialorder %v792_v55, inf  ;;  %v798_v62 = vand.u32 2147483648, %v792_v55  ;;  %vm797_vm9 = vcmp.eq.f32.partialorder %v792_v55, 0.0 }
 0x52b   :  { %v4374_v56 = vpop.eup %4373 }
 0x52c   :  { %v785_v57 = vmul.f32 %v4374_v56, %v783_v49  ;;  %v1193_v56 = vld [vmem:[#allocation17 + $0x8] sm:$0xff] }
 0x52d   :  { %v4376_v58 = vpop.eup %4375 }
 0x52e   :  { %v787_v59 = vsel %vm786_vm6, %v783_v49, %v785_v57  ;;  %v794_v60 = vmul.f32 %v4376_v58, %v792_v55  ;;  %v912_v49 = vld [vmem:[#allocation14 + $0x18] sm:$0xff] }
 0x52f   :  { %v790_v2 = vsel %vm788_vm8, %v789_v61, %v787_v59  ;;  %v5153_v52 = vpack.c.bf16 %v912_v49, %v911_v48 }
 0x530   :  { %v796_v63 = vsel %vm795_vm7, %v792_v55, %v794_v60  ;;  %v1192_v55 = vld [vmem:[#allocation17] sm:$0xff] }
 0x531   :  { %v799_v3 = vsel %vm797_vm9, %v798_v62, %v796_v63  ;;  %v5163_v60 = vpack.c.bf16 %v1193_v56, %v1192_v55  ;;  %v1194_v62 = vld [vmem:[#allocation17 + $0x10] sm:$0xff]  ;;  %v1195_v63 = vld [vmem:[#allocation17 + $0x18] sm:$0xff] }
 0x532   :  { %v800_v4 = vsub.f32 %v790_v2, %v799_v3  ;;  %v5167_v2 = vpack.c.bf16 %v1195_v63, %v1194_v62  ;;  %v1267_v3 = vld [vmem:[#allocation17 + $0x20] sm:$0xff] }
 0x534   :  { %v801_v6 = vmul.f32 %v800_v4, %v800_v4 }
 0x536   :  { %v803_v7 = vsel %vm802_vm11, %v801_v6, 0.0 }
 0x537   :  { %804 = vadd.xlane.f32.xlu1 %v803_v7  ;;  %v1269_v7 = vld [vmem:[#allocation17 + $0x30] sm:$0xff] }
 0x5c4   :  { %v805_v8 = vpop.xlane.xlu1 %804 }
 0x5c5   :  { %v806_v12 = vrot.slane %v805_v8, 4 }
 0x5c7   :  { %v807_v17 = vadd.f32 %v806_v12, %v805_v8  ;;  %v1270_v8 = vld [vmem:[#allocation17 + $0x38] sm:$0xff] }
 0x5c8   :  { %v5179_v12 = vpack.c.bf16 %v1270_v8, %v1269_v7 }
 0x5c9   :  { %v808_v24 = vrot.slane %v807_v17, 2 }
 0x5cb   :  { %v809_v25 = vadd.f32 %v808_v24, %v807_v17  ;;  %v1607_v17 = vld [vmem:[%s5552_s20] sm:$0xff]  ;;  %v1609_v24 = vld [vmem:[%s5552_s20 + $0x10] sm:$0xff] }
 0x5cc   :  { %v5191_v19 = vpack.c.bf16 %v1608_v18, %v1607_v17 }
 0x5cd   :  { %v810_v26 = vrot.slane %v809_v25, 1 }
 0x5cf   :  { %v811_v28 = vadd.f32 %v810_v26, %v809_v25  ;;  %v1610_v25 = vld [vmem:[%s5552_s20 + $0x18] sm:$0xff] }
 0x5d0   :  { %v5203_v26 = vpack.c.bf16 %v1610_v25, %v1609_v24  ;;  %v1039_v25 = vld [vmem:[#allocation16] sm:$0xff] }
 0x5d1   :  { %4315 = vpush %v811_v28  ;;  %v1682_v28 = vld [vmem:[%s5552_s20 + $0x20] sm:$0xff] }
 0x602   :  { %s4316_s7 = spop %4315 }
 0x603   :  { %v813_v29 = vstv %s4316_s7 }
 0x604   :  { %4377 = vrsqrt.f32 %v813_v29  ;;  %vm816_vm12 = vcmp.eq.f32.partialorder %v813_v29, inf  ;;  %v819_v32 = vand.u32 2147483648, %v813_v29  ;;  %vm818_vm13 = vcmp.eq.f32.partialorder %v813_v29, 0.0 }
 0x60e   :  { %v4378_v30 = vpop.eup %4377 }
 0x60f   :  { %v815_v31 = vmul.f32 %v4378_v30, %v813_v29 }
 0x611   :  { %v817_v33 = vsel %vm816_vm12, %v813_v29, %v815_v31  ;;  %v1683_v29 = vld [vmem:[%s5552_s20 + $0x28] sm:$0xff]  ;;  %v1684_v31 = vld [vmem:[%s5552_s20 + $0x30] sm:$0xff] }
 0x612   :  { %v820_v37 = vsel %vm818_vm13, %v819_v32, %v817_v33  ;;  %v5215_v30 = vpack.c.bf16 %v1683_v29, %v1682_v28  ;;  %v1685_v32 = vld [vmem:[%s5552_s20 + $0x38] sm:$0xff]  ;;  %v1040_v28 = vld [vmem:[#allocation16 + $0x8] sm:$0xff]  ;;  %vm1435_vm13 = vcmask 122880  }
 0x613   :  { %4317 = vpush %v820_v37  ;;  %v5227_v33 = vpack.c.bf16 %v1685_v32, %v1684_v31  ;;  %v5254_v29 = vpack.c.bf16 %v1040_v28, %v1039_v25 }
 0x615   :  { %4149 = vmatpush3.bf16.msra.mxu1 %v5254_v29 }
 0x616   :  { %4150 = vmatprep.subr.bf16.mxu1 %v4726_v0 }
 0x644   :  { %s4318_s27 = spop %4317 }
 0x645   :  { %s822_s28 = smax.f32 %s4732_s10, %s4318_s27 }
 0x646   :  { %v823_v40 = vstv %s822_s28  ;;  %s5584_s28 = sld [smem:[#allocation36_spill]] }
 0x647   :  { %4379 = vrcp.f32 %v823_v40 }
 0x64c   :  { %v3237_v34 = vld [vmem:[%s5584_s28] sm:$0x1] }
 0x651   :  { %v4380_v43 = vpop.eup %4379 }
 0x652   :  { %v825_v45 = vmul.f32 %v4380_v43, %v800_v4  ;;  %v1268_v4 = vld [vmem:[#allocation17 + $0x28] sm:$0xff] }
 0x653   :  { %v5173_v6 = vpack.c.bf16 %v1268_v4, %v1267_v3 }
 0x654   :  { %3824 = vmatmul.mubr.msk.f32.vlgmr.msra.gmra.mrb[4].mxu0 %vm472_vm3, %v825_v45 }
 0x655   :  { %4143 = vmatpush3.bf16.msra.mxu0 %v5146_v44  ;;  %3834 = vmatprep.mubr.msk.f32.mxu0 %vm4727_vm0, %v4728_v1 }
 0x656   :  { %4144 = vmatprep.subr.bf16.mxu0 %v4726_v0 }
 0x659   :  { %4146 = vmatpush3.bf16.msra.mxu0 %v5153_v52 }
 0x65a   :  { %4153 = vmatprep.subr.bf16.mxu0 %v4726_v0 }
 0x727   :  { %v904_v57 = vpop.f32.mrb[4].mxu0 }
 0x728   :  { %v905_v58 = vadd.f32 %v5160_v53, %v904_v57  ;;  %v3825_v59 = vpop.f32.mrb[5].mxu0 }
 0x72a   :  { %v908_v61 = vmax.f32 %v905_v58, 0.0 }
 0x72c   :  { %3835 = vmatmul.mubr.msk.f32.vlgmr.msra.gmra.mrb[6].mxu0 %vm259_vm1, %v908_v61 }
 0x72d   :  { %4155 = vmatpush3.bf16.msra.mxu0 %v5163_v60  ;;  %3859 = vmatprep.mubr.msk.f32.mxu0 %vm4727_vm0, %v4728_v1 }
 0x72e   :  { %4156 = vmatprep.subr.bf16.mxu0 %v4726_v0 }
 0x731   :  { %4158 = vmatpush3.bf16.msra.mxu0 %v5167_v2 }
 0x732   :  { %4159 = vmatprep.subr.bf16.mxu0 %v4726_v0 }
 0x734   :  { %3860 = vmatmul.mubr.msk.f32.vlgmr.msra.gmra.mrb[8].mxu0 %vm259_vm1, %v5084_v16 }
 0x735   :  { %4161 = vmatpush3.bf16.msra.mxu0 %v5173_v6  ;;  %3870 = vmatprep.mubr.msk.f32.mxu0 %vm4727_vm0, %v4728_v1 }
 0x736   :  { %4162 = vmatprep.subr.bf16.mxu0 %v4726_v0 }
 0x739   :  { %4164 = vmatpush3.bf16.msra.mxu0 %v5179_v12 }
 0x73a   :  { %4177 = vmatprep.subr.bf16.mxu0 %v4726_v0 }
 0x73c   :  { %3871 = vmatmul.mubr.msk.f32.vlgmr.msra.gmra.mrb[8].mxu0 %vm259_vm1, %v5095_v23 }
 0x73d   :  { %4179 = vmatpush3.bf16.msra.mxu0 %v5191_v19  ;;  %3906 = vmatprep.mubr.msk.f32.mxu0 %vm4727_vm0, %v4728_v1 }
 0x73e   :  { %4180 = vmatprep.subr.bf16.mxu0 %v4726_v0 }
 0x741   :  { %4182 = vmatpush3.bf16.msra.mxu0 %v5203_v26 }
 0x742   :  { %4183 = vmatprep.subr.bf16.mxu0 %v4726_v0 }
 0x744   :  { %3907 = vmatmul.mubr.msk.f32.vlgmr.msra.gmra.mrb[10].mxu0 %vm259_vm1, %v5084_v16  ;;  %v5245_v16 = vld [vmem:[%s5545_s13] ss:$0 sm:$0xff]  ;;  %s4733_s13 = smov 16  }
 0x745   :  { %4185 = vmatpush3.bf16.msra.mxu0 %v5215_v30  ;;  %3917 = vmatprep.mubr.msk.f32.mxu0 %vm4727_vm0, %v4728_v1 }
 0x746   :  { %4186 = vmatprep.subr.bf16.mxu0 %v4726_v0 }
 0x749   :  { %4188 = vmatpush3.bf16.msra.mxu0 %v5227_v33 }
 0x74a   :  { %4201 = vmatprep.subr.bf16.mxu0 %v4726_v0 }
 0x74c   :  { %3918 = vmatmul.mubr.msk.f32.vlgmr.msra.gmra.mrb[10].mxu0 %vm259_vm1, %v5095_v23 }
 0x74d   :  { %4203 = vmatpush3.bf16.msra.mxu0 %v5023_v10  ;;  %3950 = vmatprep.mubr.msk.f32.mxu0 %vm4727_vm0, %v4728_v1 }
 0x74e   :  { %4204 = vmatprep.subr.bf16.mxu0 %v4726_v0 }
 0x751   :  { %4206 = vmatpush3.bf16.msra.mxu0 %v5036_v14 }
 0x752   :  { %4222 = vmatprep.subr.bf16.mxu0 %v4726_v0 }
 0x7ff   :  { %v989_v37 = vpop.f32.mrb[6].mxu0 }
 0x800   :  { %v990_v23 = vadd.f32 %v5245_v16, %v989_v37  ;;  %v3836_v40 = vpop.f32.mrb[7].mxu0 }
 0x802   :  { %v994_v10 = vsel %vm993_vm14, %v990_v23, -inf }
 0x803   :  { %v995_v41 = vrot.slane %v994_v10, 4 }
 0x805   :  { %v996_v42 = vmax.f32 %v994_v10, %v995_v41 }
 0x807   :  { %v997_v43 = vrot.slane %v996_v42, 2 }
 0x809   :  { %v998_v45 = vmax.f32 %v996_v42, %v997_v43 }
 0x80b   :  { %v999_v48 = vrot.slane %v998_v45, 1 }
 0x80d   :  { %v1000_v14 = vmax.f32 %v998_v45, %v999_v48 }
 0x80f   :  { %v1001_v49 = vsub.f32 %v990_v23, %v1000_v14  ;;  %v1337_v55 = vpop.f32.mrb[8].mxu0 }
 0x810   :  { %v3872_v56 = vpop.f32.mrb[9].mxu0 }
 0x811   :  { %v1002_v57 = vmul.f32 1.442695, %v1001_v49  ;;  %v1115_v49 = vld [vmem:[#allocation16 + $0x10] sm:$0xff]  ;;  %v1116_v56 = vld [vmem:[#allocation16 + $0x18] sm:$0xff] }
 0x813   :  { %4381 = vpow2.f32 %v1002_v57 }
 0x81d   :  { %v4382_v58 = vpop.eup %4381 }
 0x81e   :  { %v1004_v59 = vsel %vm993_vm14, %v4382_v58, 0.0 }
 0x81f   :  { %v1005_v61 = vrot.slane %v1004_v59, 4  ;;  %v5250_v62 = vpop.f32.mrb[10].mxu0 }
 0x820   :  { %v3919_v63 = vpop.f32.mrb[11].mxu0 }
 0x821   :  { %v1006_v3 = vadd.f32 %v1005_v61, %v1004_v59 }
 0x823   :  { %v1007_v4 = vrot.slane %v1006_v3, 2 }
 0x825   :  { %v1008_v7 = vadd.f32 %v1007_v4, %v1006_v3  ;;  %v1191_v3 = vld [vmem:[%s5549_s17] sm:$0x1] }
 0x826   :  { %v1038_v4 = vld [vmem:[%s5547_s15] sm:$0x1] }
 0x827   :  { %v1009_v8 = vrot.slane %v1008_v7, 1 }
 0x829   :  { %v1010_v17 = vadd.f32 %v1009_v8, %v1008_v7  ;;  %v1460_v7 = vld [vmem:[#allocation19] sm:$0xff]  ;;  %v1461_v8 = vld [vmem:[#allocation19 + $0x8] sm:$0xff] }
 0x82a   :  { %v5286_v28 = vpack.c.bf16 %v1461_v8, %v1460_v7 }
 0x82b   :  { %4383 = vrcp.f32 %v1010_v17 }
 0x835   :  { %v4384_v18 = vpop.eup %4383 }
 0x836   :  { %v1012_v24 = vmul.f32 %v4384_v18, %v4382_v58  ;;  %v5262_v58 = vpack.c.bf16 %v1116_v56, %v1115_v49  ;;  %v4287_v18 = vadd.f32 %v1337_v55, %v1191_v3  ;;  %v5324_v49 = vld [vmem:[#allocation2 + $0x8] sm:$0xff] }
 0x838   :  { %1027 = vperm.xlu0 %4364, %v1012_v24   ;;  %1015 = vperm.xlu1 %4365, %v1012_v24  }
 0x83c   :  { %4366 = vset.pattern.permute.xlu0 %v4729_v20  ;;  %4367 = vset.pattern.permute.xlu1 %v4730_v47 }
 0x8b7   :  { %v1028_v31 = vpop.permute.xlu0 %1027  ;;  %v1016_v32 = vpop.permute.xlu1 %1015 }
 0x8b8   :  { %v1030_v37 = vmul.f32 %v1028_v31, %v5064_v50  ;;  %v1018_v23 = vmul.f32 %v1016_v32, %v5064_v50  ;;  %v1533_v32 = vld [vmem:[#allocation19 + $0x10] sm:$0xff] }
 0x8ba   :  { %v1031_v40 = vsel %vm802_vm11, %v1030_v37, 0.0  ;;  %v1019_v20 = vsel %vm802_vm11, %v1018_v23, 0.0  ;;  %v1534_v37 = vld [vmem:[#allocation19 + $0x18] sm:$0xff] }
 0x8bb   :  { %v1032_v10 = vrot.slane %v1031_v40, 4  ;;  %v1020_v41 = vrot.slane %v1019_v20, 4  ;;  %v5292_v23 = vpack.c.bf16 %v1534_v37, %v1533_v32 }
 0x8bd   :  { %v1033_v42 = vadd.f32 %v1032_v10, %v1031_v40  ;;  %v1021_v43 = vadd.f32 %v1020_v41, %v1019_v20  ;;  %v1606_v20 = vld [vmem:[%s5584_s28] sm:$0x1]  ;;  %s4734_s28 = smov [#allocation20]  }
 0x8be   :  { %v1459_v10 = vld [vmem:[%s5585_s11] sm:$0x1]  ;;  %s3517_s23 = sshll.u32 %s4734_s28, 4  ;;  %s3518_s23 = int_to_ptr.vmem [resolvable:$true] %s3517_s23 }
 0x8bf   :  { %v1022_v45 = vrot.slane %v1021_v43, 2  ;;  %v1034_v48 = vrot.slane %v1033_v42, 2  ;;  %s4675_s29 = scalar_lea.vmem %s3518_s23, 32  ;;  %p4680_p5 = scmp.lt.s32.totalorder %s3518_s23, %s3518_s23 }
 0x8c0   :  { %p4676_p4 = scmp.ne.s32.totalorder %s3518_s23, %s4675_s29  ;;  %p4681_p6 = scmp.lt.s32.totalorder %s4675_s29, %s4675_s29 }
 0x8c1   :  { %v1023_v14 = vadd.f32 %v1022_v45, %v1021_v43  ;;  %v1035_v59 = vadd.f32 %v1034_v48, %v1033_v42  ;;  %v4289_v42 = vadd.f32 %v5250_v62, %v1606_v20 }
 0x8c2   :  { %p4682_p7 = por %p4681_p6, %p4680_p5 }
 0x8c3   :  { %v1024_v57 = vrot.slane %v1023_v14, 1  ;;  %v1036_v50 = vrot.slane %v1035_v59, 1 }
 0x8c4   :  { %p4683_p8 = pnand %p4682_p7, %p4676_p4 }
 0x8c5   :  { %v1025_v61 = vadd.f32 %v1024_v57, %v1023_v14  ;;  %v1037_v63 = vadd.f32 %v1036_v50, %v1035_v59 }
 0x8c7   :  { %3842 = vmatmul.mubr.msk.f32.vlgmr.msra.gmra.mrb[6].mxu1 %vm472_vm3, %v1025_v61 }
 0x8c8   :  { %4152 = vmatpush3.bf16.msra.mxu1 %v5262_v58  ;;  %3848 = vmatprep.mubr.msk.f32.mxu1 %vm4727_vm0, %v4728_v1 }
 0x8c9   :  { %4165 = vmatprep.subr.bf16.mxu1 %v4726_v0 }
 0x8cf   :  { %3849 = vmatmul.mubr.msk.f32.vlgmr.msra.gmra.mrb[6].mxu1 %vm472_vm3, %v1037_v63 }
 0x8d0   :  { %4167 = vmatpush3.bf16.msk.msra.mxu1 %vm5109_vm10, %v4731_v35  ;;  %3881 = vmatprep.mubr.msk.f32.mxu1 %vm4727_vm0, %v4728_v1 }
 0x8d1   :  { %4168 = vmatprep.subr.bf16.mxu1 %v4726_v0 }
 0x8d4   :  { %4170 = vmatpush3.bf16.msk.msra.mxu1 %vm5117_vm5, %v4731_v35 }
 0x8d5   :  { %4171 = vmatprep.subr.bf16.mxu1 %v4726_v0 }
 0x9a2   :  { %v1186_v17 = vpop.f32.mrb[6].mxu1 }
 0x9a3   :  { %v4286_v24 = vadd.f32 %v1186_v17, %v1038_v4  ;;  %v3850_v25 = vpop.f32.mrb[7].mxu1 }
 0x9a5   :  { %v1342_v31 = vmul.f32 %v4287_v18, %v4286_v24 }
 0x9a7   :  { %3882 = vmatmul.mubr.msk.f32.vlgmr.msra.gmra.mrb[8].mxu1 %vm259_vm1, %v1342_v31 }
 0x9a8   :  { %4173 = vmatpush3.bf16.msra.mxu1 %v5286_v28  ;;  %3888 = vmatprep.mubr.msk.f32.mxu1 %vm4727_vm0, %v4728_v1 }
 0x9a9   :  { %4174 = vmatprep.subr.bf16.mxu1 %v4726_v0 }
 0x9ab   :  { %3889 = vmatmul.mubr.msk.f32.vlgmr.msra.gmra.mrb[10].mxu1 %vm472_vm3, %v1025_v61 }
 0x9ac   :  { %4176 = vmatpush3.bf16.msra.mxu1 %v5292_v23  ;;  %3895 = vmatprep.mubr.msk.f32.mxu1 %vm4727_vm0, %v4728_v1 }
 0x9ad   :  { %4189 = vmatprep.subr.bf16.mxu1 %v4726_v0 }
 0x9b3   :  { %3896 = vmatmul.mubr.msk.f32.vlgmr.msra.gmra.mrb[10].mxu1 %vm472_vm3, %v1037_v63 }
 0x9b4   :  { %4191 = vmatpush3.bf16.msk.msra.mxu1 %vm5109_vm10, %v4731_v35  ;;  %3928 = vmatprep.mubr.msk.f32.mxu1 %vm4727_vm0, %v4728_v1 }
 0x9b5   :  { %4192 = vmatprep.subr.bf16.mxu1 %v4726_v0 }
 0x9b8   :  { %4194 = vmatpush3.bf16.msk.msra.mxu1 %vm5117_vm5, %v4731_v35 }
 0x9b9   :  { %4195 = vmatprep.subr.bf16.mxu1 %v4726_v0 }
 0xa7a   :  { %v1412_v55 = vpop.f32.mrb[8].mxu1 }
 0xa7b   :  { %v3883_v40 = vpop.f32.mrb[9].mxu1 }
 0xa86   :  { %v1601_v41 = vpop.f32.mrb[10].mxu1 }
 0xa87   :  { %v4288_v43 = vadd.f32 %v1601_v41, %v1459_v10  ;;  %v3897_v45 = vpop.f32.mrb[11].mxu1  ;;  %v1424_v41 = vsub.f32 0.0, %v1412_v55 }
 0xa89   :  { %v1757_v48 = vmul.f32 %v4289_v42, %v4288_v43  ;;  %v1425_v42 = vmax.f32 %v1424_v41, 0.0 }
 0xa8b   :  { %v1758_v14 = vmul.f32 %v1757_v48, %v1342_v31  ;;  %v1416_v48 = vmax.f32 %v1412_v55, 0.0  ;;  %vm1430_vm4 = vcmp.eq.f32.partialorder %v1425_v42, 0.0 }
 0xa8d   :  { %3929 = vmatmul.mubr.msk.f32.vlgmr.msra.gmra.mrb[12].mxu1 %vm259_vm1, %v1758_v14  ;;  %vm1419_vm15 = vcmp.eq.f32.partialorder %v1416_v48, inf  ;;  %vm1421_vm6 = vcmp.eq.f32.partialorder %v1416_v48, 0.0 }
 0xa8e   :  { %4197 = vmatpush3.bf16.msra.mxu1 %v5018_v5  ;;  %3939 = vmatprep.mubr.msk.f32.mxu1 %vm4727_vm0, %v4728_v1 }
 0xa8f   :  { %4198 = vmatprep.subr.bf16.mxu1 %v4726_v0 }
 0xa92   :  { %4200 = vmatpush3.bf16.msra.mxu1 %v5021_v9 }
 0xa93   :  { %4207 = vmatprep.subr.bf16.mxu1 %v4726_v0 }
 0xa95   :  { %3940 = vmatmul.mubr.msk.f32.vlgmr.msra.gmra.mrb[14].mxu1 %vm259_vm1, %v5324_v49 }
 0xa96   :  { %4209 = vmatpush3.bf16.msra.mxu1 %v5059_v46  ;;  %3957 = vmatprep.mubr.msk.f32.mxu1 %vm4727_vm0, %v4728_v1 }
 0xa97   :  { %4210 = vmatprep.subr.bf16.mxu1 %v4726_v0 }
 0xb60   :  { %v1828_v5 = vpop.f32.mrb[12].mxu1 }
 0xb61   :  { %v3930_v62 = vpop.f32.mrb[13].mxu1  ;;  %v1840_v43 = vsub.f32 0.0, %v1828_v5 }
 0xb63   :  { %v1841_v62 = vmax.f32 %v1840_v43, 0.0 }
 0xb65   :  { %vm1844_vm7 = vcmp.eq.f32.partialorder %v1841_v62, inf  ;;  %vm1846_vm9 = vcmp.eq.f32.partialorder %v1841_v62, 0.0 }
 0xb68   :  { %v1965_v56 = vpop.f32.mrb[14].mxu1 }
 0xb69   :  { %v1966_v57 = vadd.f32 %v5043_v15, %v1965_v56  ;;  %v3941_v9 = vpop.f32.mrb[15].mxu1  ;;  %v1832_v56 = vmax.f32 %v1828_v5, 0.0 }
 0xb6b   :  { %v1969_v59 = vmax.f32 %v1966_v57, 0.0  ;;  %v5348_v57 = vld [vmem:[#allocation5 + $0x4] sm:$0xf]  ;;  %vm1835_vm8 = vcmp.eq.f32.partialorder %v1832_v56, inf  ;;  %vm1837_vm12 = vcmp.eq.f32.partialorder %v1832_v56, 0.0 }
 0xb6c   :  { %3958 = vmatmul.mubr.msk.f32.vlgmr.msra.gmra.mrb[16].mxu1 %vm472_vm3, %v5348_v57 }
 0xb6d   :  { %3951 = vmatmul.mubr.msk.f32.vlgmr.msra.gmra.mrb[12].mxu0 %vm259_vm1, %v1969_v59  ;;  %4212 = vmatpush3.bf16.msra.mxu1 %v5066_v51 }
 0xb6e   :  { %4224 = vmatpush3.bf16.msk.msra.mxu0 %vm5109_vm10, %v4731_v35  ;;  %3990 = vmatprep.mubr.msk.f32.mxu0 %vm4727_vm0, %v4728_v1 }
 0xb6f   :  { %4225 = vmatprep.subr.bf16.mxu0 %v4726_v0  ;;  %3968 = vmatprep.mubr.msk.f32.mxu1 %vm4727_vm0, %v4728_v1 }
 0xb70   :  { %4213 = vmatprep.subr.bf16.mxu1 %v4726_v0 }
 0xb71   :  { %4215 = vmatpush3.bf16.msra.mxu1 %v5074_v54 }
 0xb72   :  { %4227 = vmatpush3.bf16.msk.msra.mxu0 %vm5117_vm5, %v4731_v35  ;;  %4216 = vmatprep.subr.bf16.mxu1 %v4726_v0 }
 0xb73   :  { %4228 = vmatprep.subr.bf16.mxu0 %v4726_v0 }
 0xc40   :  { %v2050_v15 = vpop.f32.mrb[12].mxu0 }
 0xc41   :  { %v2051_v46 = vadd.f32 %v5054_v21, %v2050_v15  ;;  %v3952_v61 = vpop.f32.mrb[13].mxu0 }
 0xc43   :  { %v2054_v50 = vsel %vm418_vm2, %v2051_v46, -inf }
 0xc44   :  { %v2055_v63 = vrot.slane %v2054_v50, 4 }
 0xc46   :  { %v2056_v3 = vmax.f32 %v2054_v50, %v2055_v63  ;;  %v1431_v50 = vand.u32 2147483648, %v1425_v42 }
 0xc48   :  { %v2057_v4 = vrot.slane %v2056_v3, 2 }
 0xc4a   :  { %v2058_v7 = vmax.f32 %v2056_v3, %v2057_v4  ;;  %v1422_v3 = vand.u32 2147483648, %v1416_v48 }
 0xc4c   :  { %v2059_v8 = vrot.slane %v2058_v7, 1 }
 0xc4e   :  { %v2060_v17 = vmax.f32 %v2058_v7, %v2059_v8 }
 0xc50   :  { %v2061_v18 = vsub.f32 %v2051_v46, %v2060_v17 }
 0xc52   :  { %v2062_v24 = vmul.f32 1.442695, %v2061_v18  ;;  %v1847_v18 = vand.u32 2147483648, %v1841_v62 }
 0xc54   :  { %4385 = vpow2.f32 %v2062_v24 }
 0xc5e   :  { %v4386_v25 = vpop.eup %4385 }
 0xc5f   :  { %v2064_v31 = vsel %vm418_vm2, %v4386_v25, 0.0  ;;  %vm1428_vm2 = vcmp.eq.f32.partialorder %v1425_v42, inf }
 0xc60   :  { %v2065_v32 = vrot.slane %v2064_v31, 4 }
 0xc62   :  { %v2066_v37 = vadd.f32 %v2065_v32, %v2064_v31 }
 0xc64   :  { %v2067_v40 = vrot.slane %v2066_v37, 2 }
 0xc66   :  { %v2068_v20 = vadd.f32 %v2067_v40, %v2066_v37 }
 0xc68   :  { %v2069_v21 = vrot.slane %v2068_v20, 1 }
 0xc6a   :  { %v2070_v10 = vadd.f32 %v2069_v21, %v2068_v20 }
 0xc6c   :  { %4387 = vrcp.f32 %v2070_v10 }
 0xc6d   :  { %4389 = vrsqrt.f32 %v1425_v42 }
 0xc6e   :  { %4391 = vrsqrt.f32 %v1416_v48 }
 0xc6f   :  { %4393 = vrsqrt.f32 %v1841_v62 }
 0xc70   :  { %4395 = vrsqrt.f32 %v1832_v56 }
 0xc76   :  { %v4388_v45 = vpop.eup %4387 }
 0xc77   :  { %v2072_v14 = vmul.f32 %v4388_v45, %v4386_v25  ;;  %v4390_v55 = vpop.eup %4389  ;;  %v1838_v25 = vand.u32 2147483648, %v1832_v56 }
 0xc78   :  { %v4392_v9 = vpop.eup %4391  ;;  %v1427_v59 = vmul.f32 %v4390_v55, %v1425_v42 }
 0xc79   :  { %2087 = vperm.xlu1 %4367, %v2072_v14   ;;  %2075 = vperm.xlu0 %4366, %v2072_v14   ;;  %v4394_v5 = vpop.eup %4393  ;;  %v1418_v15 = vmul.f32 %v4392_v9, %v1416_v48 }
 0xc7a   :  { %v4396_v46 = vpop.eup %4395  ;;  %v1429_v61 = vsel %vm1428_vm2, %v1425_v42, %v1427_v59  ;;  %v1843_v51 = vmul.f32 %v4394_v5, %v1841_v62 }
 0xc7b   :  { %v1420_v63 = vsel %vm1419_vm15, %v1416_v48, %v1418_v15  ;;  %v1432_v4 = vsel %vm1430_vm4, %v1431_v50, %v1429_v61  ;;  %v1834_v7 = vmul.f32 %v4396_v46, %v1832_v56 }
 0xc7c   :  { %v1423_v8 = vsel %vm1421_vm6, %v1422_v3, %v1420_v63  ;;  %v1845_v17 = vsel %vm1844_vm7, %v1841_v62, %v1843_v51 }
 0xc7d   :  { %v5358_v54 = vsub.f32 %v1423_v8, %v1432_v4  ;;  %v1836_v24 = vsel %vm1835_vm8, %v1832_v56, %v1834_v7  ;;  %v1848_v31 = vsel %vm1846_vm9, %v1847_v18, %v1845_v17  ;;  %v2176_v17 = vpop.f32.mrb[16].mxu1 }
 0xc7e   :  { %v1839_v37 = vsel %vm1837_vm12, %v1838_v25, %v1836_v24  ;;  %v3959_v18 = vpop.f32.mrb[17].mxu1 }
 0xc7f   :  { %v1434_v32 = vmul.f32 %v5358_v54, %v5358_v54  ;;  %v5362_v40 = vsub.f32 %v1839_v37, %v1848_v31 }
 0xc81   :  { %v1436_v20 = vsel %vm1435_vm13, %v1434_v32, 0.0  ;;  %v1850_v21 = vmul.f32 %v5362_v40, %v5362_v40 }
 0xc83   :  { %v1851_v10 = vsel %vm1435_vm13, %v1850_v21, 0.0 }
 0xc98   :  { %1437 = vadd.xlane.f32.xlu0 %v1436_v20 }
 0xc9d   :  { %1852 = vadd.xlane.f32.xlu1 %v1851_v10 }
 0xcf8   :  { %v2088_v41 = vpop.permute.xlu1 %2087  ;;  %v2076_v42 = vpop.permute.xlu0 %2075 }
 0xcf9   :  { %v2090_v43 = vmul.f32 %v2088_v41, %v5324_v49  ;;  %v2078_v45 = vmul.f32 %v2076_v42, %v5324_v49 }
 0xcfb   :  { %v2091_v48 = vsel %vm259_vm1, %v2090_v43, 0.0  ;;  %v2079_v14 = vsel %vm259_vm1, %v2078_v45, 0.0 }
 0xcfc   :  { %v2092_v62 = vrot.slane %v2091_v48, 4  ;;  %v2080_v56 = vrot.slane %v2079_v14, 4 }
 0xcfe   :  { %v2093_v55 = vadd.f32 %v2092_v62, %v2091_v48  ;;  %v2081_v9 = vadd.f32 %v2080_v56, %v2079_v14 }
 0xd00   :  { %v2082_v59 = vrot.slane %v2081_v9, 2  ;;  %v2094_v5 = vrot.slane %v2093_v55, 2 }
 0xd02   :  { %v2083_v15 = vadd.f32 %v2082_v59, %v2081_v9  ;;  %v2095_v61 = vadd.f32 %v2094_v5, %v2093_v55 }
 0xd04   :  { %v2084_v46 = vrot.slane %v2083_v15, 1  ;;  %v2096_v49 = vrot.slane %v2095_v61, 1 }
 0xd06   :  { %v5372_v50 = vadd.f32 %v2084_v46, %v2083_v15  ;;  %v5381_v51 = vadd.f32 %v2096_v49, %v2095_v61  ;;  %v2180_v46 = vld [vmem:[%s5541_s9] sm:$0x1] }
 0xd08   :  { %3969 = vmatmul.mubr.msk.f32.vlgmr.msra.gmra.mrb[18].mxu1 %vm259_vm1, %v5372_v50 }
 0xd09   :  { %4218 = vmatpush3.bf16.msra.mxu1 %v5082_v13  ;;  %3979 = vmatprep.mubr.msk.f32.mxu1 %vm4727_vm0, %v4728_v1 }
 0xd0a   :  { %4219 = vmatprep.subr.bf16.mxu1 %v4726_v0 }
 0xd0d   :  { %4221 = vmatpush3.bf16.msra.mxu1 %v5089_v11 }
 0xd0e   :  { %4237 = vmatprep.subr.bf16.mxu1 %v4726_v0 }
 0xd10   :  { %3980 = vmatmul.mubr.msk.f32.vlgmr.msra.gmra.mrb[18].mxu1 %vm259_vm1, %v5381_v51 }
 0xd11   :  { %4239 = vmatpush3.bf16.msra.mxu1 %v5254_v29  ;;  %4015 = vmatprep.mubr.msk.f32.mxu1 %vm4727_vm0, %v4728_v1 }
 0xd12   :  { %4240 = vmatprep.subr.bf16.mxu1 %v4726_v0 }
 0xd25   :  { %v1438_v13 = vpop.xlane.xlu0 %1437 }
 0xd26   :  { %v1439_v63 = vrot.slane %v1438_v13, 4 }
 0xd28   :  { %v1440_v3 = vadd.f32 %v1439_v63, %v1438_v13  ;;  %v2177_v63 = vadd.f32 %v5132_v39, %v2176_v17 }
 0xd2a   :  { %v1441_v4 = vrot.slane %v1440_v3, 2  ;;  %v1853_v24 = vpop.xlane.xlu1 %1852 }
 0xd2b   :  { %v1854_v25 = vrot.slane %v1853_v24, 4 }
 0xd2c   :  { %v1442_v7 = vadd.f32 %v1441_v4, %v1440_v3 }
 0xd2d   :  { %v1855_v31 = vadd.f32 %v1854_v25, %v1853_v24 }
 0xd2e   :  { %v1443_v11 = vrot.slane %v1442_v7, 1 }
 0xd2f   :  { %v1856_v32 = vrot.slane %v1855_v31, 2 }
 0xd30   :  { %v1444_v8 = vadd.f32 %v1443_v11, %v1442_v7 }
 0xd31   :  { %v1857_v37 = vadd.f32 %v1856_v32, %v1855_v31 }
 0xd32   :  { %4319 = vpush %v1444_v8 }
 0xd33   :  { %v1858_v21 = vrot.slane %v1857_v37, 1 }
 0xd35   :  { %v1859_v45 = vadd.f32 %v1858_v21, %v1857_v37 }
 0xd63   :  { %s4320_s24 = spop %4319 }
 0xd64   :  { %v1446_v29 = vstv %s4320_s24 }
 0xd65   :  { %4397 = vrsqrt.f32 %v1446_v29  ;;  %vm1449_vm2 = vcmp.eq.f32.partialorder %v1446_v29, inf  ;;  %v1452_v41 = vand.u32 2147483648, %v1446_v29  ;;  %vm1451_vm15 = vcmp.eq.f32.partialorder %v1446_v29, 0.0 }
 0xd6f   :  { %v4398_v20 = vpop.eup %4397 }
 0xd70   :  { %v1448_v10 = vmul.f32 %v4398_v20, %v1446_v29 }
 0xd72   :  { %v1450_v42 = vsel %vm1449_vm2, %v1446_v29, %v1448_v10 }
 0xd73   :  { %v1453_v43 = vsel %vm1451_vm15, %v1452_v41, %v1450_v42 }
 0xd74   :  { %4321 = vpush %v1453_v43 }
 0xd75   :  { %4323 = vpush %v1859_v45 }
 0xda5   :  { %s4322_s16 = spop %4321 }
 0xda6   :  { %s1455_s22 = smax.f32 %s4732_s10, %s4322_s16  ;;  %s4324_s5 = spop %4323 }
 0xda7   :  { %v1456_v48 = vstv %s1455_s22  ;;  %v1861_v14 = vstv %s4324_s5 }
 0xda8   :  { %4399 = vrcp.f32 %v1456_v48  ;;  %vm1864_vm4 = vcmp.eq.f32.partialorder %v1861_v14, inf  ;;  %v1867_v59 = vand.u32 2147483648, %v1861_v14  ;;  %vm1866_vm6 = vcmp.eq.f32.partialorder %v1861_v14, 0.0 }
 0xda9   :  { %4401 = vrsqrt.f32 %v1861_v14 }
 0xdb2   :  { %v4400_v62 = vpop.eup %4399 }
 0xdb3   :  { %v4402_v56 = vpop.eup %4401  ;;  %v1458_v55 = vmul.f32 %v4400_v62, %v5358_v54 }
 0xdb4   :  { %v1863_v9 = vmul.f32 %v4402_v56, %v1861_v14 }
 0xdb5   :  { %1874 = vst.msk [vmem:[#allocation20] sm:$0x1] %vm1435_vm13, %v1458_v55 }
 0xdb6   :  { %v1865_v5 = vsel %vm1864_vm4, %v1861_v14, %v1863_v9 }
 0xdb7   :  { %v1868_v15 = vsel %vm1866_vm6, %v1867_v59, %v1865_v5 }
 0xdb8   :  { %4325 = vpush %v1868_v15 }
 0xde3   :  { %v2332_v61 = vpop.f32.mrb[18].mxu1 }
 0xde4   :  { %v4290_v49 = vadd.f32 %v2332_v61, %v2180_v46  ;;  %v3981_v13 = vpop.f32.mrb[19].mxu1 }
 0xde6   :  { %v2341_v54 = vrot.slane %v4290_v49, %v706_v38 }
 0xde8   :  { %v2343_v3 = vmul.f32 %v2341_v54, %v2177_v63 }
 0xde9   :  { %s5405_s9 = spop %4325 }
 0xdea   :  { %3991 = vmatmul.mubr.msk.f32.vlgmr.msra.gmra.mrb[14].mxu0 %vm259_vm1, %v2343_v3  ;;  %s1870_s12 = smax.f32 %s4732_s10, %s5405_s9 }
 0xdeb   :  { %4230 = vmatpush3.bf16.msra.mxu0 %v5141_v22  ;;  %3997 = vmatprep.mubr.msk.f32.mxu0 %vm4727_vm0, %v4728_v1 }
 0xdec   :  { %4231 = vmatprep.subr.bf16.mxu0 %v4726_v0 }
 0xebd   :  { %v2413_v4 = vpop.f32.mrb[14].mxu0 }
 0xebe   :  { %v2417_v7 = vmax.f32 %v2413_v4, 0.0  ;;  %v2425_v11 = vsub.f32 0.0, %v2413_v4  ;;  %v3992_v8 = vpop.f32.mrb[15].mxu0 }
 0xec0   :  { %4403 = vrsqrt.f32 %v2417_v7  ;;  %v2426_v18 = vmax.f32 %v2425_v11, 0.0  ;;  %vm2420_vm7 = vcmp.eq.f32.partialorder %v2417_v7, inf  ;;  %v2423_v25 = vand.u32 2147483648, %v2417_v7 }
 0xec1   :  { %vm2422_vm9 = vcmp.eq.f32.partialorder %v2417_v7, 0.0 }
 0xec2   :  { %4405 = vrsqrt.f32 %v2426_v18  ;;  %vm2429_vm8 = vcmp.eq.f32.partialorder %v2426_v18, inf  ;;  %v2432_v22 = vand.u32 2147483648, %v2426_v18  ;;  %vm2431_vm12 = vcmp.eq.f32.partialorder %v2426_v18, 0.0 }
 0xeca   :  { %v4404_v39 = vpop.eup %4403 }
 0xecb   :  { %v2419_v27 = vmul.f32 %v4404_v39, %v2417_v7 }
 0xecc   :  { %v4406_v38 = vpop.eup %4405 }
 0xecd   :  { %v2421_v17 = vsel %vm2420_vm7, %v2417_v7, %v2419_v27  ;;  %v2428_v24 = vmul.f32 %v4406_v38, %v2426_v18 }
 0xece   :  { %v2424_v29 = vsel %vm2422_vm9, %v2423_v25, %v2421_v17 }
 0xecf   :  { %v2430_v31 = vsel %vm2429_vm8, %v2426_v18, %v2428_v24  ;;  %vm1879_vm8 = vcmask 254080  }
 0xed0   :  { %v2433_v32 = vsel %vm2431_vm12, %v2432_v22, %v2430_v31 }
 0xed1   :  { %v2434_v37 = vsub.f32 %v2424_v29, %v2433_v32 }
 0xed3   :  { %v2435_v20 = vmul.f32 %v2434_v37, %v2434_v37 }
 0xed5   :  { %v2436_v21 = vsel %vm802_vm11, %v2435_v20, 0.0 }
 0xed6   :  { %2437 = vadd.xlane.f32.xlu0 %v2436_v21 }
 0xf63   :  { %v2438_v10 = vpop.xlane.xlu0 %2437 }
 0xf64   :  { %v2439_v41 = vrot.slane %v2438_v10, 4 }
 0xf66   :  { %v2440_v42 = vadd.f32 %v2439_v41, %v2438_v10 }
 0xf68   :  { %v2441_v43 = vrot.slane %v2440_v42, 2 }
 0xf6a   :  { %v2442_v45 = vadd.f32 %v2441_v43, %v2440_v42 }
 0xf6c   :  { %v2443_v48 = vrot.slane %v2442_v45, 1 }
 0xf6e   :  { %v2444_v14 = vadd.f32 %v2443_v48, %v2442_v45 }
 0xf70   :  { %4327 = vpush %v2444_v14 }
 0xfa1   :  { %s4328_s6 = spop %4327 }
 0xfa2   :  { %v2446_v62 = vstv %s4328_s6 }
 0xfa3   :  { %4407 = vrsqrt.f32 %v2446_v62  ;;  %vm2449_vm2 = vcmp.eq.f32.partialorder %v2446_v62, inf  ;;  %v2452_v9 = vand.u32 2147483648, %v2446_v62  ;;  %vm2451_vm15 = vcmp.eq.f32.partialorder %v2446_v62, 0.0 }
 0xfad   :  { %v4408_v56 = vpop.eup %4407 }
 0xfae   :  { %v2448_v55 = vmul.f32 %v4408_v56, %v2446_v62 }
 0xfb0   :  { %v2450_v59 = vsel %vm2449_vm2, %v2446_v62, %v2448_v55  ;;  %v2670_v55 = vld [vmem:[%s5547_s15] sm:$0x1] }
 0xfb1   :  { %v2453_v5 = vsel %vm2451_vm15, %v2452_v9, %v2450_v59 }
 0xfb2   :  { %4329 = vpush %v2453_v5 }
 0xfe3   :  { %s4330_s14 = spop %4329 }
 0xfe4   :  { %s2455_s21 = smax.f32 %s4732_s10, %s4330_s14 }
 0xfe5   :  { %v2456_v15 = vstv %s2455_s21 }
 0xfe6   :  { %4409 = vrcp.f32 %v2456_v15 }
 0xff0   :  { %v4410_v46 = vpop.eup %4409 }
 0xff1   :  { %v2458_v61 = vmul.f32 %v4410_v46, %v2434_v37 }
 0xff3   :  { %3998 = vmatmul.mubr.msk.f32.vlgmr.msra.gmra.mrb[16].mxu0 %vm472_vm3, %v2458_v61 }
 0xff4   :  { %4233 = vmatpush3.bf16.msra.mxu0 %v5146_v44  ;;  %4008 = vmatprep.mubr.msk.f32.mxu0 %vm4727_vm0, %v4728_v1 }
 0xff5   :  { %4234 = vmatprep.subr.bf16.mxu0 %v4726_v0 }
 0xff8   :  { %4236 = vmatpush3.bf16.msra.mxu0 %v5153_v52 }
 0xff9   :  { %4243 = vmatprep.subr.bf16.mxu0 %v4726_v0 }
0x10c6   :  { %v2537_v49 = vpop.f32.mrb[16].mxu0 }
0x10c7   :  { %v2538_v13 = vadd.f32 %v5160_v53, %v2537_v49  ;;  %v3999_v63 = vpop.f32.mrb[17].mxu0 }
0x10c9   :  { %v2541_v54 = vmax.f32 %v2538_v13, 0.0 }
0x10cb   :  { %4009 = vmatmul.mubr.msk.f32.vlgmr.msra.gmra.mrb[18].mxu0 %vm259_vm1, %v2541_v54 }
0x10cc   :  { %4245 = vmatpush3.bf16.msra.mxu0 %v5163_v60  ;;  %4033 = vmatprep.mubr.msk.f32.mxu0 %vm4727_vm0, %v4728_v1 }
0x10cd   :  { %4246 = vmatprep.subr.bf16.mxu0 %v4726_v0 }
0x10d0   :  { %4248 = vmatpush3.bf16.msra.mxu0 %v5167_v2 }
0x10d1   :  { %4249 = vmatprep.subr.bf16.mxu0 %v4726_v0 }
0x10d3   :  { %4034 = vmatmul.mubr.msk.f32.vlgmr.msra.gmra.mrb[20].mxu0 %vm259_vm1, %v5372_v50 }
0x10d4   :  { %4251 = vmatpush3.bf16.msra.mxu0 %v5173_v6  ;;  %4044 = vmatprep.mubr.msk.f32.mxu0 %vm4727_vm0, %v4728_v1 }
0x10d5   :  { %4252 = vmatprep.subr.bf16.mxu0 %v4726_v0 }
0x10d8   :  { %4254 = vmatpush3.bf16.msra.mxu0 %v5179_v12 }
0x10d9   :  { %4267 = vmatprep.subr.bf16.mxu0 %v4726_v0 }
0x10db   :  { %4045 = vmatmul.mubr.msk.f32.vlgmr.msra.gmra.mrb[20].mxu0 %vm259_vm1, %v5381_v51 }
0x10dc   :  { %4269 = vmatpush3.bf16.msra.mxu0 %v5191_v19  ;;  %4080 = vmatprep.mubr.msk.f32.mxu0 %vm4727_vm0, %v4728_v1 }
0x10dd   :  { %4270 = vmatprep.subr.bf16.mxu0 %v4726_v0 }
0x10e0   :  { %4272 = vmatpush3.bf16.msra.mxu0 %v5203_v26 }
0x10e1   :  { %4273 = vmatprep.subr.bf16.mxu0 %v4726_v0 }
0x10e3   :  { %4081 = vmatmul.mubr.msk.f32.vlgmr.msra.gmra.mrb[22].mxu0 %vm259_vm1, %v5372_v50 }
0x10e4   :  { %4275 = vmatpush3.bf16.msra.mxu0 %v5215_v30  ;;  %4091 = vmatprep.mubr.msk.f32.mxu0 %vm4727_vm0, %v4728_v1 }
0x10e5   :  { %4276 = vmatprep.subr.bf16.mxu0 %v4726_v0 }
0x10e8   :  { %4278 = vmatpush3.bf16.msra.mxu0 %v5227_v33 }
0x10eb   :  { %4092 = vmatmul.mubr.msk.f32.vlgmr.msra.gmra.mrb[22].mxu0 %vm259_vm1, %v5381_v51 }
0x119e   :  { %v2622_v44 = vpop.f32.mrb[18].mxu0 }
0x119f   :  { %v2623_v52 = vadd.f32 %v5245_v16, %v2622_v44  ;;  %v4010_v53 = vpop.f32.mrb[19].mxu0 }
0x11a1   :  { %v2626_v60 = vsel %vm993_vm14, %v2623_v52, -inf }
0x11a2   :  { %v2627_v2 = vrot.slane %v2626_v60, 4 }
0x11a4   :  { %v2628_v6 = vmax.f32 %v2626_v60, %v2627_v2 }
0x11a6   :  { %v2629_v12 = vrot.slane %v2628_v6, 2 }
0x11a8   :  { %v2630_v19 = vmax.f32 %v2628_v6, %v2629_v12 }
0x11aa   :  { %v2631_v26 = vrot.slane %v2630_v19, 1 }
0x11ac   :  { %v2632_v30 = vmax.f32 %v2630_v19, %v2631_v26 }
0x11ae   :  { %v2633_v50 = vsub.f32 %v2623_v52, %v2632_v30  ;;  %v2969_v3 = vpop.f32.mrb[20].mxu0 }
0x11af   :  { %v4046_v4 = vpop.f32.mrb[21].mxu0 }
0x11b0   :  { %v2634_v7 = vmul.f32 1.442695, %v2633_v50 }
0x11b2   :  { %4411 = vpow2.f32 %v2634_v7 }
0x11bc   :  { %v4412_v33 = vpop.eup %4411 }
0x11bd   :  { %v2636_v51 = vsel %vm993_vm14, %v4412_v33, 0.0 }
0x11be   :  { %v2637_v11 = vrot.slane %v2636_v51, 4  ;;  %v5451_v8 = vpop.f32.mrb[22].mxu0 }
0x11bf   :  { %v4093_v16 = vpop.f32.mrb[23].mxu0  ;;  %v4294_v36 = vadd.f32 %v5451_v8, %v3237_v34 }
0x11c0   :  { %v2638_v18 = vadd.f32 %v2637_v11, %v2636_v51 }
0x11c2   :  { %v2639_v39 = vrot.slane %v2638_v18, 2 }
0x11c4   :  { %v2640_v27 = vadd.f32 %v2639_v39, %v2638_v18 }
0x11c6   :  { %v2641_v38 = vrot.slane %v2640_v27, 1 }
0x11c8   :  { %v2642_v17 = vadd.f32 %v2641_v38, %v2640_v27 }
0x11ca   :  { %4413 = vrcp.f32 %v2642_v17 }
0x11d4   :  { %v4414_v24 = vpop.eup %4413 }
0x11d5   :  { %v2644_v25 = vmul.f32 %v4414_v24, %v4412_v33 }
0x11d7   :  { %2659 = vperm.xlu1 %4367, %v2644_v25   ;;  %2647 = vperm.xlu0 %4366, %v2644_v25  }
0x11db   :  { %4368 = vset.pattern.permute.xlu0 %v4730_v47 }
0x1256   :  { %v2660_v22 = vpop.permute.xlu1 %2659  ;;  %v2648_v31 = vpop.permute.xlu0 %2647 }
0x1257   :  { %v2662_v29 = vmul.f32 %v2660_v22, %v5348_v57  ;;  %v2650_v32 = vmul.f32 %v2648_v31, %v5348_v57 }
0x1259   :  { %v2663_v37 = vsel %vm802_vm11, %v2662_v29, 0.0  ;;  %v2651_v20 = vsel %vm802_vm11, %v2650_v32, 0.0 }
0x125a   :  { %v2664_v21 = vrot.slane %v2663_v37, 4  ;;  %v2652_v10 = vrot.slane %v2651_v20, 4 }
0x125c   :  { %v2665_v41 = vadd.f32 %v2664_v21, %v2663_v37  ;;  %v2653_v42 = vadd.f32 %v2652_v10, %v2651_v20 }
0x125e   :  { %v2654_v43 = vrot.slane %v2653_v42, 2  ;;  %v2666_v45 = vrot.slane %v2665_v41, 2 }
0x1260   :  { %v2655_v48 = vadd.f32 %v2654_v43, %v2653_v42  ;;  %v2667_v62 = vadd.f32 %v2666_v45, %v2665_v41 }
0x1262   :  { %v2656_v14 = vrot.slane %v2655_v48, 1  ;;  %v2668_v57 = vrot.slane %v2667_v62, 1 }
0x1264   :  { %v2657_v47 = vadd.f32 %v2656_v14, %v2655_v48  ;;  %v2669_v56 = vadd.f32 %v2668_v57, %v2667_v62 }
0x1266   :  { %4016 = vmatmul.mubr.msk.f32.vlgmr.msra.gmra.mrb[20].mxu1 %vm472_vm3, %v2657_v47 }
0x1267   :  { %4242 = vmatpush3.bf16.msra.mxu1 %v5262_v58  ;;  %4022 = vmatprep.mubr.msk.f32.mxu1 %vm4727_vm0, %v4728_v1  ;;  %v2823_v58 = vld [vmem:[%s5549_s17] sm:$0x1] }
0x1268   :  { %4255 = vmatprep.subr.bf16.mxu1 %v4726_v0  ;;  %v4292_v59 = vadd.f32 %v2969_v3, %v2823_v58 }
0x126e   :  { %4023 = vmatmul.mubr.msk.f32.vlgmr.msra.gmra.mrb[20].mxu1 %vm472_vm3, %v2669_v56 }
0x126f   :  { %4257 = vmatpush3.bf16.msk.msra.mxu1 %vm5109_vm10, %v4731_v35  ;;  %4055 = vmatprep.mubr.msk.f32.mxu1 %vm4727_vm0, %v4728_v1 }
0x1270   :  { %4258 = vmatprep.subr.bf16.mxu1 %v4726_v0 }
0x1273   :  { %4260 = vmatpush3.bf16.msk.msra.mxu1 %vm5117_vm5, %v4731_v35 }
0x1274   :  { %4261 = vmatprep.subr.bf16.mxu1 %v4726_v0 }
0x1341   :  { %v2818_v9 = vpop.f32.mrb[20].mxu1 }
0x1342   :  { %v4291_v5 = vadd.f32 %v2818_v9, %v2670_v55  ;;  %v4024_v15 = vpop.f32.mrb[21].mxu1  ;;  %v1871_v55 = vstv %s1870_s12 }
0x1344   :  { %v2974_v46 = vmul.f32 %v4292_v59, %v4291_v5 }
0x1346   :  { %4056 = vmatmul.mubr.msk.f32.vlgmr.msra.gmra.mrb[22].mxu1 %vm259_vm1, %v2974_v46 }
0x1347   :  { %4263 = vmatpush3.bf16.msra.mxu1 %v5286_v28  ;;  %4062 = vmatprep.mubr.msk.f32.mxu1 %vm4727_vm0, %v4728_v1 }
0x1348   :  { %4264 = vmatprep.subr.bf16.mxu1 %v4726_v0 }
0x134a   :  { %4063 = vmatmul.mubr.msk.f32.vlgmr.msra.gmra.mrb[24].mxu1 %vm472_vm3, %v2657_v47 }
0x134b   :  { %4266 = vmatpush3.bf16.msra.mxu1 %v5292_v23  ;;  %4069 = vmatprep.mubr.msk.f32.mxu1 %vm4727_vm0, %v4728_v1 }
0x134c   :  { %4279 = vmatprep.subr.bf16.mxu1 %v4726_v0 }
0x1352   :  { %4070 = vmatmul.mubr.msk.f32.vlgmr.msra.gmra.mrb[24].mxu1 %vm472_vm3, %v2669_v56 }
0x1353   :  { %4281 = vmatpush3.bf16.msk.msra.mxu1 %vm5109_vm10, %v4731_v35  ;;  %4102 = vmatprep.mubr.msk.f32.mxu1 %vm4727_vm0, %v4728_v1  ;;  %v3090_v1 = vld [vmem:[%s5585_s11] sm:$0x1] }
0x1354   :  { %4282 = vmatprep.subr.bf16.mxu1 %v4726_v0 }
0x1357   :  { %4284 = vmatpush3.bf16.msk.msra.mxu1 %vm5117_vm5, %v4731_v35 }
0x1419   :  { %v3044_v28 = vpop.f32.mrb[22].mxu1 }
0x141a   :  { %v3048_v23 = vmax.f32 %v3044_v28, 0.0  ;;  %v3056_v61 = vsub.f32 0.0, %v3044_v28  ;;  %v4057_v49 = vpop.f32.mrb[23].mxu1 }
0x141c   :  { %4415 = vrsqrt.f32 %v3048_v23  ;;  %v3057_v13 = vmax.f32 %v3056_v61, 0.0  ;;  %vm3051_vm0 = vcmp.eq.f32.partialorder %v3048_v23, inf  ;;  %v3054_v12 = vand.u32 2147483648, %v3048_v23 }
0x141d   :  { %vm3053_vm10 = vcmp.eq.f32.partialorder %v3048_v23, 0.0 }
0x141e   :  { %4417 = vrsqrt.f32 %v3057_v13  ;;  %vm3060_vm3 = vcmp.eq.f32.partialorder %v3057_v13, inf  ;;  %v3063_v19 = vand.u32 2147483648, %v3057_v13  ;;  %vm3062_vm5 = vcmp.eq.f32.partialorder %v3057_v13, 0.0 }
0x1425   :  { %v3232_v0 = vpop.f32.mrb[24].mxu1 }
0x1426   :  { %v4416_v63 = vpop.eup %4415  ;;  %v4293_v35 = vadd.f32 %v3232_v0, %v3090_v1  ;;  %v4071_v54 = vpop.f32.mrb[25].mxu1 }
0x1427   :  { %v3050_v44 = vmul.f32 %v4416_v63, %v3048_v23 }
0x1428   :  { %v4418_v52 = vpop.eup %4417  ;;  %v3388_v53 = vmul.f32 %v4294_v36, %v4293_v35 }
0x1429   :  { %v3052_v60 = vsel %vm3051_vm0, %v3048_v23, %v3050_v44  ;;  %v3059_v2 = vmul.f32 %v4418_v52, %v3057_v13 }
0x142a   :  { %v3389_v6 = vmul.f32 %v3388_v53, %v2974_v46  ;;  %v3055_v30 = vsel %vm3053_vm10, %v3054_v12, %v3052_v60 }
0x142b   :  { %v3061_v26 = vsel %vm3060_vm3, %v3057_v13, %v3059_v2 }
0x142c   :  { %4103 = vmatmul.mubr.msk.f32.vlgmr.msra.gmra.mrb[26].mxu1 %vm259_vm1, %v3389_v6  ;;  %v3064_v50 = vsel %vm3062_vm5, %v3063_v19, %v3061_v26 }
0x142d   :  { %v3065_v3 = vsub.f32 %v3055_v30, %v3064_v50 }
0x142f   :  { %v3066_v4 = vmul.f32 %v3065_v3, %v3065_v3 }
0x1431   :  { %v3067_v7 = vsel %vm1435_vm13, %v3066_v4, 0.0 }
0x1432   :  { %3068 = vadd.xlane.f32.xlu1 %v3067_v7 }
0x14bf   :  { %v3069_v33 = vpop.xlane.xlu1 %3068 }
0x14c0   :  { %v3070_v51 = vrot.slane %v3069_v33, 4 }
0x14c2   :  { %v3071_v11 = vadd.f32 %v3070_v51, %v3069_v33 }
0x14c4   :  { %v3072_v8 = vrot.slane %v3071_v11, 2 }
0x14c6   :  { %v3073_v16 = vadd.f32 %v3072_v8, %v3071_v11 }
0x14c8   :  { %v3074_v18 = vrot.slane %v3073_v16, 1 }
0x14ca   :  { %v3075_v39 = vadd.f32 %v3074_v18, %v3073_v16 }
0x14cc   :  { %4331 = vpush %v3075_v39 }
0x14fd   :  { %s4332_s20 = spop %4331 }
0x14fe   :  { %v3077_v27 = vstv %s4332_s20 }
0x14ff   :  { %4419 = vrsqrt.f32 %v3077_v27  ;;  %v3459_v38 = vpop.f32.mrb[26].mxu1  ;;  %vm3080_vm1 = vcmp.eq.f32.partialorder %v3077_v27, inf  ;;  %v3083_v32 = vand.u32 2147483648, %v3077_v27  ;;  %vm3082_vm11 = vcmp.eq.f32.partialorder %v3077_v27, 0.0 }
0x1500   :  { %v3463_v17 = vmax.f32 %v3459_v38, 0.0  ;;  %v3471_v24 = vsub.f32 0.0, %v3459_v38  ;;  %v4104_v25 = vpop.f32.mrb[27].mxu1 }
0x1502   :  { %4421 = vrsqrt.f32 %v3463_v17  ;;  %v3472_v22 = vmax.f32 %v3471_v24, 0.0  ;;  %vm3466_vm14 = vcmp.eq.f32.partialorder %v3463_v17, inf  ;;  %v3469_v45 = vand.u32 2147483648, %v3463_v17 }
0x1503   :  { %vm3468_vm6 = vcmp.eq.f32.partialorder %v3463_v17, 0.0 }
0x1504   :  { %4423 = vrsqrt.f32 %v3472_v22  ;;  %vm3475_vm4 = vcmp.eq.f32.partialorder %v3472_v22, inf  ;;  %v3478_v48 = vand.u32 2147483648, %v3472_v22  ;;  %vm3477_vm7 = vcmp.eq.f32.partialorder %v3472_v22, 0.0 }
0x1505   :  { %4425 = vrcp.f32 %v1871_v55 }
0x1509   :  { %v4420_v31 = vpop.eup %4419 }
0x150a   :  { %v3079_v29 = vmul.f32 %v4420_v31, %v3077_v27 }
0x150c   :  { %v4422_v37 = vpop.eup %4421  ;;  %v3081_v20 = vsel %vm3080_vm1, %v3077_v27, %v3079_v29 }
0x150d   :  { %v3084_v21 = vsel %vm3082_vm11, %v3083_v32, %v3081_v20  ;;  %v3465_v10 = vmul.f32 %v4422_v37, %v3463_v17 }
0x150e   :  { %v4424_v41 = vpop.eup %4423  ;;  %4333 = vpush %v3084_v21 }
0x150f   :  { %v3467_v42 = vsel %vm3466_vm14, %v3463_v17, %v3465_v10  ;;  %v3474_v43 = vmul.f32 %v4424_v41, %v3472_v22  ;;  %v4426_v9 = vpop.eup %4425 }
0x1510   :  { %v3470_v62 = vsel %vm3468_vm6, %v3469_v45, %v3467_v42  ;;  %v1873_v59 = vmul.f32 %v4426_v9, %v5362_v40 }
0x1511   :  { %v3476_v14 = vsel %vm3475_vm4, %v3472_v22, %v3474_v43 }
0x1512   :  { %v3479_v47 = vsel %vm3477_vm7, %v3478_v48, %v3476_v14 }
0x1513   :  { %v3480_v57 = vsub.f32 %v3470_v62, %v3479_v47 }
0x1515   :  { %v3481_v56 = vmul.f32 %v3480_v57, %v3480_v57 }
0x1517   :  { %v3482_v58 = vsel %vm1435_vm13, %v3481_v56, 0.0 }
0x1518   :  { %3483 = vadd.xlane.f32.xlu0 %v3482_v58 }
0x152e   :  { %1876 = vrot.lane.b32.xlu0 %v1873_v59, %s4733_s13 }
0x153f   :  { %s4334_s8 = spop %4333 }
0x1540   :  { %s3086_s0 = smax.f32 %s4732_s10, %s4334_s8 }
0x1541   :  { %v3087_v5 = vstv %s3086_s0 }
0x1542   :  { %4427 = vrcp.f32 %v3087_v5 }
0x154c   :  { %v4428_v15 = vpop.eup %4427 }
0x154d   :  { %v3089_v46 = vmul.f32 %v4428_v15, %v3065_v3 }
0x154f   :  { %3505 = vst.msk [vmem:[#allocation20 + $0x1] sm:$0x1] %vm1435_vm13, %v3089_v46 }
0x15a5   :  { %v3484_v28 = vpop.xlane.xlu0 %3483 }
0x15a6   :  { %v3485_v23 = vrot.slane %v3484_v28, 4 }
0x15a8   :  { %v3486_v61 = vadd.f32 %v3485_v23, %v3484_v28 }
0x15a9   :  { %v1877_v49 = vpop.permute.xlu0 %1876 }
0x15aa   :  { %v3487_v13 = vrot.slane %v3486_v61, 2  ;;  %1880 = vst.msk [vmem:[#allocation20] sm:$0x1] %vm1879_vm8, %v1877_v49 }
0x15ac   :  { %v3488_v40 = vadd.f32 %v3487_v13, %v3486_v61 }
0x15ae   :  { %v3489_v34 = vrot.slane %v3488_v40, 1 }
0x15b0   :  { %v3490_v1 = vadd.f32 %v3489_v34, %v3488_v40 }
0x15b2   :  { %4335 = vpush %v3490_v1 }
0x15e3   :  { %s4336_s1 = spop %4335 }
0x15e4   :  { %v3492_v0 = vstv %s4336_s1 }
0x15e5   :  { %4429 = vrsqrt.f32 %v3492_v0  ;;  %vm3495_vm9 = vcmp.eq.f32.partialorder %v3492_v0, inf  ;;  %v3498_v35 = vand.u32 2147483648, %v3492_v0  ;;  %vm3497_vm13 = vcmp.eq.f32.partialorder %v3492_v0, 0.0 }
0x15ef   :  { %v4430_v63 = vpop.eup %4429 }
0x15f0   :  { %v3494_v36 = vmul.f32 %v4430_v63, %v3492_v0 }
0x15f2   :  { %v3496_v54 = vsel %vm3495_vm9, %v3492_v0, %v3494_v36 }
0x15f3   :  { %v3499_v44 = vsel %vm3497_vm13, %v3498_v35, %v3496_v54 }
0x15f4   :  { %4337 = vpush %v3499_v44 }
0x1625   :  { %s4338_s7 = spop %4337 }
0x1626   :  { %s3501_s27 = smax.f32 %s4732_s10, %s4338_s7 }
0x1627   :  { %v3502_v52 = vstv %s3501_s27 }
0x1628   :  { %4431 = vrcp.f32 %v3502_v52 }
0x1632   :  { %v4432_v53 = vpop.eup %4431 }
0x1633   :  { %v3504_v60 = vmul.f32 %v4432_v53, %v3480_v57 }
0x1635   :  { %3507 = vrot.lane.b32.xlu1 %v3504_v60, %s4733_s13 }
0x16a7   :  { %v3508_v2 = vpop.permute.xlu1 %3507 }
0x16a8   :  { %3510 = vst.msk [vmem:[#allocation20 + $0x1] sm:$0x1] %vm1879_vm8, %v3508_v2 }
0x16a9   :  { %4686 = shalt.err (!%p4683_p8)
}
0x16aa   :  { %s5586_s24 = sld [smem:[#allocation37_spill]] }
0x16b0   :  { %s4687_s16 = scalar_lea.hbm %s5586_s24, 32 }
0x16b1   :  { %p4688_p9 = scmp.ne.s32.totalorder %s5586_s24, %s4687_s16  ;;  %p4691_p10 = scmp.lt.u32.totalorder %s4687_s16, %s5586_s24 }
0x16b3   :  { %p4693_p11 = pnand %p4691_p10, %p4688_p9 }
0x16b5   :  { %4696 = shalt.err (!%p4693_p11)
}
0x16b6   :  { %3520 = dma.vmem_to_hbm [thread:$0]  %s3518_s23, 32, %s5586_s24, [#allocation4]  }
0x16b7   :  { %4709 = dma.done.wait [#allocation4], 32  }
0x16b8   :  { %4710 = vsyncadd [#allocation4], 4294967264 }
0x16b9   :  { %3524 = vsyncpa [#allocation3], 1 }
0x16ba   :  { %3525 = vsyncpa [#allocation6], 1 }
0x16bb   :  { %3526 = vsyncpa [#allocation9], 1 }
0x16bc   :  { %3527 = vsyncpa [#allocation12], 1 }
0x16bd   :  { %3528 = vsyncpa [#allocation15], 1 }
0x16be   :  { %3529 = vsyncpa [#allocation18], 1 }
0x16bf   :  { %3530 = vsyncpa [#allocation4], 1 }

</bundles_post_ra>
